<compile_context>
chip_gen: v7x
topology: tpu7x:2x2x1
jax: 0.10.0
libtpu: 0.0.40
codegen_flags: <defaults>
</compile_context>

<pallas_src>
import jax
import jax.numpy as jnp
from jax import lax
from jax.experimental import pallas as pl
from jax.experimental.pallas import tpu as pltpu


_COMPILER_PARAMS = pltpu.CompilerParams(
    dimension_semantics=("arbitrary",),
    vmem_limit_bytes=32 * 1024 * 1024,  # explicit scoped-VMEM bound; actual use < 1 MiB
)


def _full_spec(shape):
    """Single whole-array block (grid=(1,))."""
    nd = len(shape)
    return pl.BlockSpec(shape, lambda i, _nd=nd: (0,) * _nd)


# ------------------------------- Pallas kernels --------------------------------

def _conv_pool_kernel(w_ref, b_ref, p_ref, o_ref):
    """Fused conv(as matmul) + 2x2 max-pool + bias + ReLU, transposed (lane-dense) layout.

    p_ref: (4, K, R) bf16  im2col patches; leading dim = pool parity (dh*2+dw),
                           columns = (ph, pw, n).
    w_ref: (OC, K)   bf16  flattened conv weights (same K feature order).
    b_ref: (OC, 1)   f32
    o_ref: (OC, R)   bf16  pooled activation map.
    """
    def par(k):
        return jnp.dot(w_ref[...], p_ref[k], preferred_element_type=jnp.float32)

    acc = jnp.maximum(jnp.maximum(par(0), par(1)), jnp.maximum(par(2), par(3)))
    # max-pool commutes with (+bias, ReLU): relu(max_i(a_i) + b) == max_i relu(a_i + b)
    o_ref[...] = jnp.maximum(acc + b_ref[...], 0.0).astype(o_ref.dtype)


def _conv_pool_fc_kernel(p_ref, w2_ref, b2_ref,
                         fc1w_ref, fc1b_ref, fc2w_ref, fc2b_ref,
                         fc3w_ref, fc3b_ref, o_ref):
    """conv2 (+bias+ReLU+2x2 pool) fused with fc1 -> fc2 -> fc3 (all ReLU).

    p_ref:    (4, 25*N, K2) bf16  conv2 patches; leading dim = pool parity,
                                  rows = (ph, pw, n).
    w2_ref:   (K2, 16) bf16       b2_ref:  (1, 16)  f32
    fc1w_ref: (25, 16, 120) bf16  (spatial-major regrouping of torch's CHW flatten)
    fc1b_ref: (1, 120) f32
    fc2w_ref: (120, 84) bf16      fc2b_ref: (1, 84) f32
    fc3w_ref: (84, 10)  bf16      fc3b_ref: (1, 10) f32
    o_ref:    (N, 10)   f32
    """
    n = o_ref.shape[0]

    def par(k):
        return jnp.dot(p_ref[k], w2_ref[...], preferred_element_type=jnp.float32)

    acc = jnp.maximum(jnp.maximum(par(0), par(1)), jnp.maximum(par(2), par(3)))
    h = jnp.maximum(acc + b2_ref[...], 0.0)                       # (25*N, 16) f32

    # fc1: contraction over (spatial r, channel); rows r*n .. r*n+n-1 are the
    # n samples at spatial position r.  25 small MXU dots, f32 accumulation.
    acc1 = jnp.zeros((n, fc1b_ref.shape[-1]), jnp.float32) + fc1b_ref[...]
    for r in range(fc1w_ref.shape[0]):
        xr = h[r * n:(r + 1) * n, :].astype(jnp.bfloat16)         # (N, 16)
        acc1 = acc1 + jnp.dot(xr, fc1w_ref[r], preferred_element_type=jnp.float32)
    h1 = jnp.maximum(acc1, 0.0).astype(jnp.bfloat16)              # (N, 120)

    h2 = jnp.dot(h1, fc2w_ref[...], preferred_element_type=jnp.float32)
    h2 = jnp.maximum(h2 + fc2b_ref[...], 0.0).astype(jnp.bfloat16)  # (N, 84)

    h3 = jnp.dot(h2, fc3w_ref[...], preferred_element_type=jnp.float32)
    # NOTE: the reference PyTorch module applies ReLU to fc3 as well -- keep it.
    o_ref[...] = jnp.maximum(h3 + fc3b_ref[...], 0.0)


# --------------------------------- JAX glue -------------------------------------

def _patches_and_weight(x_nchw, w_oihw):
    """im2col patches of x and the matching flattened conv weight.

    Both come from the SAME lax.conv_general_dilated_patches construction, so the
    (ic, kh, kw) feature ordering of patches and weight matrix matches by design.
    """
    k = w_oihw.shape[-1]
    patches = lax.conv_general_dilated_patches(x_nchw, (k, k), (1, 1), "VALID")
    wflat = lax.conv_general_dilated_patches(w_oihw, (k, k), (1, 1), "VALID")
    wflat = wflat.reshape(w_oihw.shape[0], -1)          # (OC, IC*K*K)
    return patches, wflat


def lenet_forward(params, x):
    """Forward pass of the PyTorch `Net` module.  x: (N, 1, 32, 32) f32 -> (N, 10) f32."""
    n = x.shape[0]
    f32, bf16 = jnp.float32, jnp.bfloat16

    # ----------------------- stage 1: conv1 + ReLU + pool -----------------------
    p1, w1 = _patches_and_weight(x, params["conv1_w"])          # (N,25,28,28), (6,25)
    # oh = 2*ph + dh, ow = 2*pw + dw  ->  (parity=dh*2+dw, feature, ph*pw*n)
    p1 = p1.reshape(n, 25, 14, 2, 14, 2)                        # (n, f, ph, dh, pw, dw)
    p1 = p1.transpose(3, 5, 1, 2, 4, 0).reshape(4, 25, 14 * 14 * n)
    p1 = jnp.pad(p1, ((0, 0), (0, 7), (0, 0))).astype(bf16)     # K: 25 -> 32
    w1 = jnp.pad(w1, ((0, 0), (0, 7))).astype(bf16)             # (6, 32)
    b1 = params["conv1_b"].reshape(6, 1).astype(f32)

    r1 = 14 * 14 * n
    pooled1 = pl.pallas_call(
        _conv_pool_kernel,
        out_shape=jax.ShapeDtypeStruct((6, r1), bf16),
        grid=(1,),
        in_specs=[_full_spec((6, 32)), _full_spec((6, 1)), _full_spec((4, 32, r1))],
        out_specs=_full_spec((6, r1)),
        compiler_params=_COMPILER_PARAMS,
    )(w1, b1, p1)                                               # (6, 196*n) bf16

    # --------------- stage 2: conv2 + ReLU + pool + fc1/fc2/fc3 -----------------
    p1map = pooled1.reshape(6, 14, 14, n).transpose(3, 0, 1, 2)  # (n, 6, 14, 14) bf16
    p2, w2 = _patches_and_weight(p1map, params["conv2_w"])       # (n,150,10,10), (16,150)
    p2 = p2.reshape(n, 150, 5, 2, 5, 2)                          # (n, g, s, d, t, e)
    p2 = p2.transpose(3, 5, 2, 4, 0, 1).reshape(4, 25 * n, 150)  # (parity, (s,t,n), g)
    p2 = jnp.pad(p2, ((0, 0), (0, 0), (0, 2))).astype(bf16)      # K: 150 -> 152
    w2 = jnp.pad(w2.T, ((0, 2), (0, 0))).astype(bf16)            # (152, 16)
    b2 = params["conv2_b"].reshape(1, 16).astype(f32)

    # fc1 rows follow torch's CHW flatten (c*25 + r); regroup to (r, c, out).
    fc1w = params["fc1_w"].reshape(16, 25, 120).transpose(1, 0, 2).astype(bf16)
    fc1b = params["fc1_b"].reshape(1, 120).astype(f32)
    fc2w = params["fc2_w"].astype(bf16)
    fc2b = params["fc2_b"].reshape(1, 84).astype(f32)
    fc3w = params["fc3_w"].astype(bf16)
    fc3b = params["fc3_b"].reshape(1, 10).astype(f32)

    out = pl.pallas_call(
        _conv_pool_fc_kernel,
        out_shape=jax.ShapeDtypeStruct((n, 10), f32),
        grid=(1,),
        in_specs=[
            _full_spec((4, 25 * n, 152)), _full_spec((152, 16)), _full_spec((1, 16)),
            _full_spec((25, 16, 120)), _full_spec((1, 120)),
            _full_spec((120, 84)), _full_spec((1, 84)),
            _full_spec((84, 10)), _full_spec((1, 10)),
        ],
        out_specs=_full_spec((n, 10)),
        compiler_params=_COMPILER_PARAMS,
    )(p2, w2, b2, fc1w, fc1b, fc2w, fc2b, fc3w, fc3b)
    return out


def lenet_reference(params, x):
    """Plain-XLA reference with matching bf16-operand / f32-accumulate numerics."""
    bf16, f32 = jnp.bfloat16, jnp.float32
    dn = ("NCHW", "OIHW", "NCHW")

    def conv_relu(v, w, b):
        y = lax.conv_general_dilated(v.astype(bf16), w.astype(bf16), (1, 1), "VALID",
                                     dimension_numbers=dn, preferred_element_type=f32)
        return jnp.maximum(y + b.reshape(1, -1, 1, 1), 0.0)

    def pool(v):
        return lax.reduce_window(v, -jnp.inf, lax.max, (1, 1, 2, 2), (1, 1, 2, 2), "VALID")

    def fc_relu(v, w, b):
        y = jnp.dot(v.astype(bf16), w.astype(bf16), preferred_element_type=f32)
        return jnp.maximum(y + b, 0.0)

    y = pool(conv_relu(x, params["conv1_w"], params["conv1_b"]))
    y = y.astype(bf16)                                   # kernel stores pooled1 in bf16
    y = pool(conv_relu(y, params["conv2_w"], params["conv2_b"]))
    y = y.reshape(y.shape[0], -1)                        # NCHW flatten == torch .view
    y = fc_relu(y, params["fc1_w"], params["fc1_b"])
    y = fc_relu(y, params["fc2_w"], params["fc2_b"])
    y = fc_relu(y, params["fc3_w"], params["fc3_b"])     # ReLU on fc3, per the spec
    return y


def init_params(key):
    """Deterministic synthetic init (PyTorch-style uniform(-1/sqrt(fan_in), ..))."""
    ks = jax.random.split(key, 10)

    def u(k, shape, fan_in):
        bound = 1.0 / (fan_in ** 0.5)
        return jax.random.uniform(k, shape, jnp.float32, -bound, bound)

    return {
        "conv1_w": u(ks[0], (6, 1, 5, 5), 25),
        "conv1_b": u(ks[1], (6,), 25),
        "conv2_w": u(ks[2], (16, 6, 5, 5), 150),
        "conv2_b": u(ks[3], (16,), 150),
        "fc1_w": u(ks[4], (16 * 5 * 5, 120), 400),   # stored (in, out)
        "fc1_b": u(ks[5], (120,), 400),
        "fc2_w": u(ks[6], (120, 84), 120),
        "fc2_b": u(ks[7], (84,), 120),
        "fc3_w": u(ks[8], (84, 10), 84),
        "fc3_b": u(ks[9], (10,), 84),
    }


if __name__ == "__main__":
    key = jax.random.PRNGKey(0)
    pkey, xkey = jax.random.split(key)
    params = init_params(pkey)
    # LeNet needs 32x32 single-channel input so the 16*5*5 flatten holds.
    x = jax.random.normal(xkey, (2, 1, 32, 32), dtype=jnp.float32)

    fwd = jax.jit(lenet_forward)
    out = fwd(params, x)
    jax.block_until_ready(out)
    assert out.shape == (2, 10), out.shape

    ref = jax.jit(lenet_reference)(params, x)
    jax.block_until_ready(ref)
    assert jnp.allclose(out, ref, atol=3e-2, rtol=3e-2), (out, ref)

    print("KERNEL_OK")
</pallas_src>

<mosaic_0001>
module attributes {stable_mosaic.version = 11 : i64} {
  func.func @_conv_pool_kernel(%arg0: i32, %arg1: memref<6x32xbf16, #tpu.memory_space<vmem>>, %arg2: memref<6x1xf32, #tpu.memory_space<vmem>>, %arg3: memref<4x32x392xbf16, #tpu.memory_space<vmem>>, %arg4: memref<6x392xbf16, #tpu.memory_space<vmem>>) attributes {dimension_semantics = [#tpu.dimension_semantics<arbitrary>], iteration_bounds = array<i64: 1>, scalar_prefetch = 0 : i64, scratch_operands = 0 : i64, tpu.core_type = #tpu.core_type<tc>, window_params = [{pipeline_mode = #tpu.pipeline_mode<synchronous>, transform_indices = @transform_0, window_bounds = array<i64: 6, 32>}, {pipeline_mode = #tpu.pipeline_mode<synchronous>, transform_indices = @transform_1, window_bounds = array<i64: 6, 1>}, {pipeline_mode = #tpu.pipeline_mode<synchronous>, transform_indices = @transform_2, window_bounds = array<i64: 4, 32, 392>}, {pipeline_mode = #tpu.pipeline_mode<synchronous>, transform_indices = @transform_3, window_bounds = array<i64: 6, 392>}]} {
    %c0 = arith.constant 0 : index
    %c0_0 = arith.constant 0 : index
    %0 = vector.load %arg1[%c0, %c0_0] : memref<6x32xbf16, #tpu.memory_space<vmem>>, vector<6x32xbf16>
    %c0_1 = arith.constant 0 : index
    %c0_2 = arith.constant 0 : index
    %c0_3 = arith.constant 0 : index
    %1 = vector.load %arg3[%c0_1, %c0_2, %c0_3] : memref<4x32x392xbf16, #tpu.memory_space<vmem>>, vector<1x32x392xbf16>
    %2 = vector.shape_cast %1 : vector<1x32x392xbf16> to vector<32x392xbf16>
    %cst = arith.constant dense<0.000000e+00> : vector<6x392xf32>
    %3 = tpu.matmul %0, %2, %cst {dimension_numbers = #tpu.dot_dimension_numbers<[1], [0], [0], [1], [0, 0, 1, 1], [], []>} : vector<6x32xbf16>, vector<32x392xbf16>, vector<6x392xf32> -> vector<6x392xf32>
    %c0_4 = arith.constant 0 : index
    %c0_5 = arith.constant 0 : index
    %4 = vector.load %arg1[%c0_4, %c0_5] : memref<6x32xbf16, #tpu.memory_space<vmem>>, vector<6x32xbf16>
    %c1 = arith.constant 1 : index
    %c0_6 = arith.constant 0 : index
    %c0_7 = arith.constant 0 : index
    %5 = vector.load %arg3[%c1, %c0_6, %c0_7] : memref<4x32x392xbf16, #tpu.memory_space<vmem>>, vector<1x32x392xbf16>
    %6 = vector.shape_cast %5 : vector<1x32x392xbf16> to vector<32x392xbf16>
    %cst_8 = arith.constant dense<0.000000e+00> : vector<6x392xf32>
    %7 = tpu.matmul %4, %6, %cst_8 {dimension_numbers = #tpu.dot_dimension_numbers<[1], [0], [0], [1], [0, 0, 1, 1], [], []>} : vector<6x32xbf16>, vector<32x392xbf16>, vector<6x392xf32> -> vector<6x392xf32>
    %8 = arith.maximumf %3, %7 : vector<6x392xf32>
    %c0_9 = arith.constant 0 : index
    %c0_10 = arith.constant 0 : index
    %9 = vector.load %arg1[%c0_9, %c0_10] : memref<6x32xbf16, #tpu.memory_space<vmem>>, vector<6x32xbf16>
    %c2 = arith.constant 2 : index
    %c0_11 = arith.constant 0 : index
    %c0_12 = arith.constant 0 : index
    %10 = vector.load %arg3[%c2, %c0_11, %c0_12] : memref<4x32x392xbf16, #tpu.memory_space<vmem>>, vector<1x32x392xbf16>
    %11 = vector.shape_cast %10 : vector<1x32x392xbf16> to vector<32x392xbf16>
    %cst_13 = arith.constant dense<0.000000e+00> : vector<6x392xf32>
    %12 = tpu.matmul %9, %11, %cst_13 {dimension_numbers = #tpu.dot_dimension_numbers<[1], [0], [0], [1], [0, 0, 1, 1], [], []>} : vector<6x32xbf16>, vector<32x392xbf16>, vector<6x392xf32> -> vector<6x392xf32>
    %c0_14 = arith.constant 0 : index
    %c0_15 = arith.constant 0 : index
    %13 = vector.load %arg1[%c0_14, %c0_15] : memref<6x32xbf16, #tpu.memory_space<vmem>>, vector<6x32xbf16>
    %c3 = arith.constant 3 : index
    %c0_16 = arith.constant 0 : index
    %c0_17 = arith.constant 0 : index
    %14 = vector.load %arg3[%c3, %c0_16, %c0_17] : memref<4x32x392xbf16, #tpu.memory_space<vmem>>, vector<1x32x392xbf16>
    %15 = vector.shape_cast %14 : vector<1x32x392xbf16> to vector<32x392xbf16>
    %cst_18 = arith.constant dense<0.000000e+00> : vector<6x392xf32>
    %16 = tpu.matmul %13, %15, %cst_18 {dimension_numbers = #tpu.dot_dimension_numbers<[1], [0], [0], [1], [0, 0, 1, 1], [], []>} : vector<6x32xbf16>, vector<32x392xbf16>, vector<6x392xf32> -> vector<6x392xf32>
    %17 = arith.maximumf %12, %16 : vector<6x392xf32>
    %18 = arith.maximumf %8, %17 : vector<6x392xf32>
    %c0_19 = arith.constant 0 : index
    %c0_20 = arith.constant 0 : index
    %19 = vector.load %arg2[%c0_19, %c0_20] : memref<6x1xf32, #tpu.memory_space<vmem>>, vector<6x1xf32>
    %20 = vector.broadcast %19 : vector<6x1xf32> to vector<6x392xf32>
    %21 = arith.addf %18, %20 : vector<6x392xf32>
    %cst_21 = arith.constant 0.000000e+00 : f32
    %22 = vector.broadcast %cst_21 : f32 to vector<6x392xf32>
    %23 = arith.maximumf %21, %22 : vector<6x392xf32>
    %24 = arith.truncf %23 : vector<6x392xf32> to vector<6x392xbf16>
    %c0_22 = arith.constant 0 : index
    %c0_23 = arith.constant 0 : index
    %25 = vector.load %arg4[%c0_22, %c0_23] : memref<6x392xbf16, #tpu.memory_space<vmem>>, vector<6x392xbf16>
    tpu.vector_store %arg4[%c0_22, %c0_23], %24 {strides = array<i32>} : memref<6x392xbf16, #tpu.memory_space<vmem>>, vector<6x392xbf16>,
    return
  }
  func.func @transform_0(%arg0: i32) -> (i32, i32) {
    %c0_i32 = arith.constant 0 : i32
    %c0_i32_0 = arith.constant 0 : i32
    %c0_i32_1 = arith.constant 0 : i32
    return %c0_i32, %c0_i32_0 : i32, i32
  }
  func.func @transform_1(%arg0: i32) -> (i32, i32) {
    %c0_i32 = arith.constant 0 : i32
    %c0_i32_0 = arith.constant 0 : i32
    %c0_i32_1 = arith.constant 0 : i32
    return %c0_i32, %c0_i32_0 : i32, i32
  }
  func.func @transform_2(%arg0: i32) -> (i32, i32, i32) {
    %c0_i32 = arith.constant 0 : i32
    %c0_i32_0 = arith.constant 0 : i32
    %c0_i32_1 = arith.constant 0 : i32
    %c0_i32_2 = arith.constant 0 : i32
    return %c0_i32, %c0_i32_0, %c0_i32_1 : i32, i32, i32
  }
  func.func @transform_3(%arg0: i32) -> (i32, i32) {
    %c0_i32 = arith.constant 0 : i32
    %c0_i32_0 = arith.constant 0 : i32
    %c0_i32_1 = arith.constant 0 : i32
    return %c0_i32, %c0_i32_0 : i32, i32
  }
}

module attributes {stable_mosaic.version = 11 : i64} {
  func.func @_conv_pool_fc_kernel(%arg0: i32, %arg1: memref<4x50x152xbf16, #tpu.memory_space<vmem>>, %arg2: memref<152x16xbf16, #tpu.memory_space<vmem>>, %arg3: memref<1x16xf32, #tpu.memory_space<vmem>>, %arg4: memref<25x16x120xbf16, #tpu.memory_space<vmem>>, %arg5: memref<1x120xf32, #tpu.memory_space<vmem>>, %arg6: memref<120x84xbf16, #tpu.memory_space<vmem>>, %arg7: memref<1x84xf32, #tpu.memory_space<vmem>>, %arg8: memref<84x10xbf16, #tpu.memory_space<vmem>>, %arg9: memref<1x10xf32, #tpu.memory_space<vmem>>, %arg10: memref<2x10xf32, #tpu.memory_space<vmem>>) attributes {dimension_semantics = [#tpu.dimension_semantics<arbitrary>], iteration_bounds = array<i64: 1>, scalar_prefetch = 0 : i64, scratch_operands = 0 : i64, tpu.core_type = #tpu.core_type<tc>, window_params = [{pipeline_mode = #tpu.pipeline_mode<synchronous>, transform_indices = @transform_0, window_bounds = array<i64: 4, 50, 152>}, {pipeline_mode = #tpu.pipeline_mode<synchronous>, transform_indices = @transform_1, window_bounds = array<i64: 152, 16>}, {pipeline_mode = #tpu.pipeline_mode<synchronous>, transform_indices = @transform_2, window_bounds = array<i64: 1, 16>}, {pipeline_mode = #tpu.pipeline_mode<synchronous>, transform_indices = @transform_3, window_bounds = array<i64: 25, 16, 120>}, {pipeline_mode = #tpu.pipeline_mode<synchronous>, transform_indices = @transform_4, window_bounds = array<i64: 1, 120>}, {pipeline_mode = #tpu.pipeline_mode<synchronous>, transform_indices = @transform_5, window_bounds = array<i64: 120, 84>}, {pipeline_mode = #tpu.pipeline_mode<synchronous>, transform_indices = @transform_6, window_bounds = array<i64: 1, 84>}, {pipeline_mode = #tpu.pipeline_mode<synchronous>, transform_indices = @transform_7, window_bounds = array<i64: 84, 10>}, {pipeline_mode = #tpu.pipeline_mode<synchronous>, transform_indices = @transform_8, window_bounds = array<i64: 1, 10>}, {pipeline_mode = #tpu.pipeline_mode<synchronous>, transform_indices = @transform_9, window_bounds = array<i64: 2, 10>}]} {
    %c0 = arith.constant 0 : index
    %c0_0 = arith.constant 0 : index
    %c0_1 = arith.constant 0 : index
    %0 = vector.load %arg1[%c0, %c0_0, %c0_1] : memref<4x50x152xbf16, #tpu.memory_space<vmem>>, vector<1x50x152xbf16>
    %1 = vector.shape_cast %0 : vector<1x50x152xbf16> to vector<50x152xbf16>
    %c0_2 = arith.constant 0 : index
    %c0_3 = arith.constant 0 : index
    %2 = vector.load %arg2[%c0_2, %c0_3] : memref<152x16xbf16, #tpu.memory_space<vmem>>, vector<152x16xbf16>
    %cst = arith.constant dense<0.000000e+00> : vector<50x16xf32>
    %3 = tpu.matmul %1, %2, %cst {dimension_numbers = #tpu.dot_dimension_numbers<[1], [0], [0], [1], [0, 0, 1, 1], [], []>} : vector<50x152xbf16>, vector<152x16xbf16>, vector<50x16xf32> -> vector<50x16xf32>
    %c1 = arith.constant 1 : index
    %c0_4 = arith.constant 0 : index
    %c0_5 = arith.constant 0 : index
    %4 = vector.load %arg1[%c1, %c0_4, %c0_5] : memref<4x50x152xbf16, #tpu.memory_space<vmem>>, vector<1x50x152xbf16>
    %5 = vector.shape_cast %4 : vector<1x50x152xbf16> to vector<50x152xbf16>
    %c0_6 = arith.constant 0 : index
    %c0_7 = arith.constant 0 : index
    %6 = vector.load %arg2[%c0_6, %c0_7] : memref<152x16xbf16, #tpu.memory_space<vmem>>, vector<152x16xbf16>
    %cst_8 = arith.constant dense<0.000000e+00> : vector<50x16xf32>
    %7 = tpu.matmul %5, %6, %cst_8 {dimension_numbers = #tpu.dot_dimension_numbers<[1], [0], [0], [1], [0, 0, 1, 1], [], []>} : vector<50x152xbf16>, vector<152x16xbf16>, vector<50x16xf32> -> vector<50x16xf32>
    %8 = arith.maximumf %3, %7 : vector<50x16xf32>
    %c2 = arith.constant 2 : index
    %c0_9 = arith.constant 0 : index
    %c0_10 = arith.constant 0 : index
    %9 = vector.load %arg1[%c2, %c0_9, %c0_10] : memref<4x50x152xbf16, #tpu.memory_space<vmem>>, vector<1x50x152xbf16>
    %10 = vector.shape_cast %9 : vector<1x50x152xbf16> to vector<50x152xbf16>
    %c0_11 = arith.constant 0 : index
    %c0_12 = arith.constant 0 : index
    %11 = vector.load %arg2[%c0_11, %c0_12] : memref<152x16xbf16, #tpu.memory_space<vmem>>, vector<152x16xbf16>
    %cst_13 = arith.constant dense<0.000000e+00> : vector<50x16xf32>
    %12 = tpu.matmul %10, %11, %cst_13 {dimension_numbers = #tpu.dot_dimension_numbers<[1], [0], [0], [1], [0, 0, 1, 1], [], []>} : vector<50x152xbf16>, vector<152x16xbf16>, vector<50x16xf32> -> vector<50x16xf32>
    %c3 = arith.constant 3 : index
    %c0_14 = arith.constant 0 : index
    %c0_15 = arith.constant 0 : index
    %13 = vector.load %arg1[%c3, %c0_14, %c0_15] : memref<4x50x152xbf16, #tpu.memory_space<vmem>>, vector<1x50x152xbf16>
    %14 = vector.shape_cast %13 : vector<1x50x152xbf16> to vector<50x152xbf16>
    %c0_16 = arith.constant 0 : index
    %c0_17 = arith.constant 0 : index
    %15 = vector.load %arg2[%c0_16, %c0_17] : memref<152x16xbf16, #tpu.memory_space<vmem>>, vector<152x16xbf16>
    %cst_18 = arith.constant dense<0.000000e+00> : vector<50x16xf32>
    %16 = tpu.matmul %14, %15, %cst_18 {dimension_numbers = #tpu.dot_dimension_numbers<[1], [0], [0], [1], [0, 0, 1, 1], [], []>} : vector<50x152xbf16>, vector<152x16xbf16>, vector<50x16xf32> -> vector<50x16xf32>
    %17 = arith.maximumf %12, %16 : vector<50x16xf32>
    %18 = arith.maximumf %8, %17 : vector<50x16xf32>
    %c0_19 = arith.constant 0 : index
    %c0_20 = arith.constant 0 : index
    %19 = vector.load %arg3[%c0_19, %c0_20] : memref<1x16xf32, #tpu.memory_space<vmem>>, vector<1x16xf32>
    %20 = vector.broadcast %19 : vector<1x16xf32> to vector<50x16xf32>
    %21 = arith.addf %18, %20 : vector<50x16xf32>
    %cst_21 = arith.constant 0.000000e+00 : f32
    %22 = vector.broadcast %cst_21 : f32 to vector<50x16xf32>
    %23 = arith.maximumf %21, %22 : vector<50x16xf32>
    %cst_22 = arith.constant 0.000000e+00 : f32
    %24 = vector.broadcast %cst_22 : f32 to vector<2x120xf32>
    %c0_23 = arith.constant 0 : index
    %c0_24 = arith.constant 0 : index
    %25 = vector.load %arg5[%c0_23, %c0_24] : memref<1x120xf32, #tpu.memory_space<vmem>>, vector<1x120xf32>
    %26 = vector.broadcast %25 : vector<1x120xf32> to vector<2x120xf32>
    %27 = arith.addf %24, %26 : vector<2x120xf32>
    %28 = vector.extract_strided_slice %23 {offsets = [0, 0], sizes = [2, 16], strides = [1, 1]} : vector<50x16xf32> to vector<2x16xf32>
    %29 = arith.truncf %28 : vector<2x16xf32> to vector<2x16xbf16>
    %c0_25 = arith.constant 0 : index
    %c0_26 = arith.constant 0 : index
    %c0_27 = arith.constant 0 : index
    %30 = vector.load %arg4[%c0_25, %c0_26, %c0_27] : memref<25x16x120xbf16, #tpu.memory_space<vmem>>, vector<1x16x120xbf16>
    %31 = vector.shape_cast %30 : vector<1x16x120xbf16> to vector<16x120xbf16>
    %cst_28 = arith.constant dense<0.000000e+00> : vector<2x120xf32>
    %32 = tpu.matmul %29, %31, %cst_28 {dimension_numbers = #tpu.dot_dimension_numbers<[1], [0], [0], [1], [0, 0, 1, 1], [], []>} : vector<2x16xbf16>, vector<16x120xbf16>, vector<2x120xf32> -> vector<2x120xf32>
    %33 = arith.addf %27, %32 : vector<2x120xf32>
    %34 = vector.extract_strided_slice %23 {offsets = [2, 0], sizes = [2, 16], strides = [1, 1]} : vector<50x16xf32> to vector<2x16xf32>
    %35 = arith.truncf %34 : vector<2x16xf32> to vector<2x16xbf16>
    %c1_29 = arith.constant 1 : index
    %c0_30 = arith.constant 0 : index
    %c0_31 = arith.constant 0 : index
    %36 = vector.load %arg4[%c1_29, %c0_30, %c0_31] : memref<25x16x120xbf16, #tpu.memory_space<vmem>>, vector<1x16x120xbf16>
    %37 = vector.shape_cast %36 : vector<1x16x120xbf16> to vector<16x120xbf16>
    %cst_32 = arith.constant dense<0.000000e+00> : vector<2x120xf32>
    %38 = tpu.matmul %35, %37, %cst_32 {dimension_numbers = #tpu.dot_dimension_numbers<[1], [0], [0], [1], [0, 0, 1, 1], [], []>} : vector<2x16xbf16>, vector<16x120xbf16>, vector<2x120xf32> -> vector<2x120xf32>
    %39 = arith.addf %33, %38 : vector<2x120xf32>
    %40 = vector.extract_strided_slice %23 {offsets = [4, 0], sizes = [2, 16], strides = [1, 1]} : vector<50x16xf32> to vector<2x16xf32>
    %41 = arith.truncf %40 : vector<2x16xf32> to vector<2x16xbf16>
    %c2_33 = arith.constant 2 : index
    %c0_34 = arith.constant 0 : index
    %c0_35 = arith.constant 0 : index
    %42 = vector.load %arg4[%c2_33, %c0_34, %c0_35] : memref<25x16x120xbf16, #tpu.memory_space<vmem>>, vector<1x16x120xbf16>
    %43 = vector.shape_cast %42 : vector<1x16x120xbf16> to vector<16x120xbf16>
    %cst_36 = arith.constant dense<0.000000e+00> : vector<2x120xf32>
    %44 = tpu.matmul %41, %43, %cst_36 {dimension_numbers = #tpu.dot_dimension_numbers<[1], [0], [0], [1], [0, 0, 1, 1], [], []>} : vector<2x16xbf16>, vector<16x120xbf16>, vector<2x120xf32> -> vector<2x120xf32>
    %45 = arith.addf %39, %44 : vector<2x120xf32>
    %46 = vector.extract_strided_slice %23 {offsets = [6, 0], sizes = [2, 16], strides = [1, 1]} : vector<50x16xf32> to vector<2x16xf32>
    %47 = arith.truncf %46 : vector<2x16xf32> to vector<2x16xbf16>
    %c3_37 = arith.constant 3 : index
    %c0_38 = arith.constant 0 : index
    %c0_39 = arith.constant 0 : index
    %48 = vector.load %arg4[%c3_37, %c0_38, %c0_39] : memref<25x16x120xbf16, #tpu.memory_space<vmem>>, vector<1x16x120xbf16>
    %49 = vector.shape_cast %48 : vector<1x16x120xbf16> to vector<16x120xbf16>
    %cst_40 = arith.constant dense<0.000000e+00> : vector<2x120xf32>
    %50 = tpu.matmul %47, %49, %cst_40 {dimension_numbers = #tpu.dot_dimension_numbers<[1], [0], [0], [1], [0, 0, 1, 1], [], []>} : vector<2x16xbf16>, vector<16x120xbf16>, vector<2x120xf32> -> vector<2x120xf32>
    %51 = arith.addf %45, %50 : vector<2x120xf32>
    %52 = vector.extract_strided_slice %23 {offsets = [8, 0], sizes = [2, 16], strides = [1, 1]} : vector<50x16xf32> to vector<2x16xf32>
    %53 = arith.truncf %52 : vector<2x16xf32> to vector<2x16xbf16>
    %c4 = arith.constant 4 : index
    %c0_41 = arith.constant 0 : index
    %c0_42 = arith.constant 0 : index
    %54 = vector.load %arg4[%c4, %c0_41, %c0_42] : memref<25x16x120xbf16, #tpu.memory_space<vmem>>, vector<1x16x120xbf16>
    %55 = vector.shape_cast %54 : vector<1x16x120xbf16> to vector<16x120xbf16>
    %cst_43 = arith.constant dense<0.000000e+00> : vector<2x120xf32>
    %56 = tpu.matmul %53, %55, %cst_43 {dimension_numbers = #tpu.dot_dimension_numbers<[1], [0], [0], [1], [0, 0, 1, 1], [], []>} : vector<2x16xbf16>, vector<16x120xbf16>, vector<2x120xf32> -> vector<2x120xf32>
    %57 = arith.addf %51, %56 : vector<2x120xf32>
    %58 = vector.extract_strided_slice %23 {offsets = [10, 0], sizes = [2, 16], strides = [1, 1]} : vector<50x16xf32> to vector<2x16xf32>
    %59 = arith.truncf %58 : vector<2x16xf32> to vector<2x16xbf16>
    %c5 = arith.constant 5 : index
    %c0_44 = arith.constant 0 : index
    %c0_45 = arith.constant 0 : index
    %60 = vector.load %arg4[%c5, %c0_44, %c0_45] : memref<25x16x120xbf16, #tpu.memory_space<vmem>>, vector<1x16x120xbf16>
    %61 = vector.shape_cast %60 : vector<1x16x120xbf16> to vector<16x120xbf16>
    %cst_46 = arith.constant dense<0.000000e+00> : vector<2x120xf32>
    %62 = tpu.matmul %59, %61, %cst_46 {dimension_numbers = #tpu.dot_dimension_numbers<[1], [0], [0], [1], [0, 0, 1, 1], [], []>} : vector<2x16xbf16>, vector<16x120xbf16>, vector<2x120xf32> -> vector<2x120xf32>
    %63 = arith.addf %57, %62 : vector<2x120xf32>
    %64 = vector.extract_strided_slice %23 {offsets = [12, 0], sizes = [2, 16], strides = [1, 1]} : vector<50x16xf32> to vector<2x16xf32>
    %65 = arith.truncf %64 : vector<2x16xf32> to vector<2x16xbf16>
    %c6 = arith.constant 6 : index
    %c0_47 = arith.constant 0 : index
    %c0_48 = arith.constant 0 : index
    %66 = vector.load %arg4[%c6, %c0_47, %c0_48] : memref<25x16x120xbf16, #tpu.memory_space<vmem>>, vector<1x16x120xbf16>
    %67 = vector.shape_cast %66 : vector<1x16x120xbf16> to vector<16x120xbf16>
    %cst_49 = arith.constant dense<0.000000e+00> : vector<2x120xf32>
    %68 = tpu.matmul %65, %67, %cst_49 {dimension_numbers = #tpu.dot_dimension_numbers<[1], [0], [0], [1], [0, 0, 1, 1], [], []>} : vector<2x16xbf16>, vector<16x120xbf16>, vector<2x120xf32> -> vector<2x120xf32>
    %69 = arith.addf %63, %68 : vector<2x120xf32>
    %70 = vector.extract_strided_slice %23 {offsets = [14, 0], sizes = [2, 16], strides = [1, 1]} : vector<50x16xf32> to vector<2x16xf32>
    %71 = arith.truncf %70 : vector<2x16xf32> to vector<2x16xbf16>
    %c7 = arith.constant 7 : index
    %c0_50 = arith.constant 0 : index
    %c0_51 = arith.constant 0 : index
    %72 = vector.load %arg4[%c7, %c0_50, %c0_51] : memref<25x16x120xbf16, #tpu.memory_space<vmem>>, vector<1x16x120xbf16>
    %73 = vector.shape_cast %72 : vector<1x16x120xbf16> to vector<16x120xbf16>
    %cst_52 = arith.constant dense<0.000000e+00> : vector<2x120xf32>
    %74 = tpu.matmul %71, %73, %cst_52 {dimension_numbers = #tpu.dot_dimension_numbers<[1], [0], [0], [1], [0, 0, 1, 1], [], []>} : vector<2x16xbf16>, vector<16x120xbf16>, vector<2x120xf32> -> vector<2x120xf32>
    %75 = arith.addf %69, %74 : vector<2x120xf32>
    %76 = vector.extract_strided_slice %23 {offsets = [16, 0], sizes = [2, 16], strides = [1, 1]} : vector<50x16xf32> to vector<2x16xf32>
    %77 = arith.truncf %76 : vector<2x16xf32> to vector<2x16xbf16>
    %c8 = arith.constant 8 : index
    %c0_53 = arith.constant 0 : index
    %c0_54 = arith.constant 0 : index
    %78 = vector.load %arg4[%c8, %c0_53, %c0_54] : memref<25x16x120xbf16, #tpu.memory_space<vmem>>, vector<1x16x120xbf16>
    %79 = vector.shape_cast %78 : vector<1x16x120xbf16> to vector<16x120xbf16>
    %cst_55 = arith.constant dense<0.000000e+00> : vector<2x120xf32>
    %80 = tpu.matmul %77, %79, %cst_55 {dimension_numbers = #tpu.dot_dimension_numbers<[1], [0], [0], [1], [0, 0, 1, 1], [], []>} : vector<2x16xbf16>, vector<16x120xbf16>, vector<2x120xf32> -> vector<2x120xf32>
    %81 = arith.addf %75, %80 : vector<2x120xf32>
    %82 = vector.extract_strided_slice %23 {offsets = [18, 0], sizes = [2, 16], strides = [1, 1]} : vector<50x16xf32> to vector<2x16xf32>
    %83 = arith.truncf %82 : vector<2x16xf32> to vector<2x16xbf16>
    %c9 = arith.constant 9 : index
    %c0_56 = arith.constant 0 : index
    %c0_57 = arith.constant 0 : index
    %84 = vector.load %arg4[%c9, %c0_56, %c0_57] : memref<25x16x120xbf16, #tpu.memory_space<vmem>>, vector<1x16x120xbf16>
    %85 = vector.shape_cast %84 : vector<1x16x120xbf16> to vector<16x120xbf16>
    %cst_58 = arith.constant dense<0.000000e+00> : vector<2x120xf32>
    %86 = tpu.matmul %83, %85, %cst_58 {dimension_numbers = #tpu.dot_dimension_numbers<[1], [0], [0], [1], [0, 0, 1, 1], [], []>} : vector<2x16xbf16>, vector<16x120xbf16>, vector<2x120xf32> -> vector<2x120xf32>
    %87 = arith.addf %81, %86 : vector<2x120xf32>
    %88 = vector.extract_strided_slice %23 {offsets = [20, 0], sizes = [2, 16], strides = [1, 1]} : vector<50x16xf32> to vector<2x16xf32>
    %89 = arith.truncf %88 : vector<2x16xf32> to vector<2x16xbf16>
    %c10 = arith.constant 10 : index
    %c0_59 = arith.constant 0 : index
    %c0_60 = arith.constant 0 : index
    %90 = vector.load %arg4[%c10, %c0_59, %c0_60] : memref<25x16x120xbf16, #tpu.memory_space<vmem>>, vector<1x16x120xbf16>
    %91 = vector.shape_cast %90 : vector<1x16x120xbf16> to vector<16x120xbf16>
    %cst_61 = arith.constant dense<0.000000e+00> : vector<2x120xf32>
    %92 = tpu.matmul %89, %91, %cst_61 {dimension_numbers = #tpu.dot_dimension_numbers<[1], [0], [0], [1], [0, 0, 1, 1], [], []>} : vector<2x16xbf16>, vector<16x120xbf16>, vector<2x120xf32> -> vector<2x120xf32>
    %93 = arith.addf %87, %92 : vector<2x120xf32>
    %94 = vector.extract_strided_slice %23 {offsets = [22, 0], sizes = [2, 16], strides = [1, 1]} : vector<50x16xf32> to vector<2x16xf32>
    %95 = arith.truncf %94 : vector<2x16xf32> to vector<2x16xbf16>
    %c11 = arith.constant 11 : index
    %c0_62 = arith.constant 0 : index
    %c0_63 = arith.constant 0 : index
    %96 = vector.load %arg4[%c11, %c0_62, %c0_63] : memref<25x16x120xbf16, #tpu.memory_space<vmem>>, vector<1x16x120xbf16>
    %97 = vector.shape_cast %96 : vector<1x16x120xbf16> to vector<16x120xbf16>
    %cst_64 = arith.constant dense<0.000000e+00> : vector<2x120xf32>
    %98 = tpu.matmul %95, %97, %cst_64 {dimension_numbers = #tpu.dot_dimension_numbers<[1], [0], [0], [1], [0, 0, 1, 1], [], []>} : vector<2x16xbf16>, vector<16x120xbf16>, vector<2x120xf32> -> vector<2x120xf32>
    %99 = arith.addf %93, %98 : vector<2x120xf32>
    %100 = vector.extract_strided_slice %23 {offsets = [24, 0], sizes = [2, 16], strides = [1, 1]} : vector<50x16xf32> to vector<2x16xf32>
    %101 = arith.truncf %100 : vector<2x16xf32> to vector<2x16xbf16>
    %c12 = arith.constant 12 : index
    %c0_65 = arith.constant 0 : index
    %c0_66 = arith.constant 0 : index
    %102 = vector.load %arg4[%c12, %c0_65, %c0_66] : memref<25x16x120xbf16, #tpu.memory_space<vmem>>, vector<1x16x120xbf16>
    %103 = vector.shape_cast %102 : vector<1x16x120xbf16> to vector<16x120xbf16>
    %cst_67 = arith.constant dense<0.000000e+00> : vector<2x120xf32>
    %104 = tpu.matmul %101, %103, %cst_67 {dimension_numbers = #tpu.dot_dimension_numbers<[1], [0], [0], [1], [0, 0, 1, 1], [], []>} : vector<2x16xbf16>, vector<16x120xbf16>, vector<2x120xf32> -> vector<2x120xf32>
    %105 = arith.addf %99, %104 : vector<2x120xf32>
    %106 = vector.extract_strided_slice %23 {offsets = [26, 0], sizes = [2, 16], strides = [1, 1]} : vector<50x16xf32> to vector<2x16xf32>
    %107 = arith.truncf %106 : vector<2x16xf32> to vector<2x16xbf16>
    %c13 = arith.constant 13 : index
    %c0_68 = arith.constant 0 : index
    %c0_69 = arith.constant 0 : index
    %108 = vector.load %arg4[%c13, %c0_68, %c0_69] : memref<25x16x120xbf16, #tpu.memory_space<vmem>>, vector<1x16x120xbf16>
    %109 = vector.shape_cast %108 : vector<1x16x120xbf16> to vector<16x120xbf16>
    %cst_70 = arith.constant dense<0.000000e+00> : vector<2x120xf32>
    %110 = tpu.matmul %107, %109, %cst_70 {dimension_numbers = #tpu.dot_dimension_numbers<[1], [0], [0], [1], [0, 0, 1, 1], [], []>} : vector<2x16xbf16>, vector<16x120xbf16>, vector<2x120xf32> -> vector<2x120xf32>
    %111 = arith.addf %105, %110 : vector<2x120xf32>
    %112 = vector.extract_strided_slice %23 {offsets = [28, 0], sizes = [2, 16], strides = [1, 1]} : vector<50x16xf32> to vector<2x16xf32>
    %113 = arith.truncf %112 : vector<2x16xf32> to vector<2x16xbf16>
    %c14 = arith.constant 14 : index
    %c0_71 = arith.constant 0 : index
    %c0_72 = arith.constant 0 : index
    %114 = vector.load %arg4[%c14, %c0_71, %c0_72] : memref<25x16x120xbf16, #tpu.memory_space<vmem>>, vector<1x16x120xbf16>
    %115 = vector.shape_cast %114 : vector<1x16x120xbf16> to vector<16x120xbf16>
    %cst_73 = arith.constant dense<0.000000e+00> : vector<2x120xf32>
    %116 = tpu.matmul %113, %115, %cst_73 {dimension_numbers = #tpu.dot_dimension_numbers<[1], [0], [0], [1], [0, 0, 1, 1], [], []>} : vector<2x16xbf16>, vector<16x120xbf16>, vector<2x120xf32> -> vector<2x120xf32>
    %117 = arith.addf %111, %116 : vector<2x120xf32>
    %118 = vector.extract_strided_slice %23 {offsets = [30, 0], sizes = [2, 16], strides = [1, 1]} : vector<50x16xf32> to vector<2x16xf32>
    %119 = arith.truncf %118 : vector<2x16xf32> to vector<2x16xbf16>
    %c15 = arith.constant 15 : index
    %c0_74 = arith.constant 0 : index
    %c0_75 = arith.constant 0 : index
    %120 = vector.load %arg4[%c15, %c0_74, %c0_75] : memref<25x16x120xbf16, #tpu.memory_space<vmem>>, vector<1x16x120xbf16>
    %121 = vector.shape_cast %120 : vector<1x16x120xbf16> to vector<16x120xbf16>
    %cst_76 = arith.constant dense<0.000000e+00> : vector<2x120xf32>
    %122 = tpu.matmul %119, %121, %cst_76 {dimension_numbers = #tpu.dot_dimension_numbers<[1], [0], [0], [1], [0, 0, 1, 1], [], []>} : vector<2x16xbf16>, vector<16x120xbf16>, vector<2x120xf32> -> vector<2x120xf32>
    %123 = arith.addf %117, %122 : vector<2x120xf32>
    %124 = vector.extract_strided_slice %23 {offsets = [32, 0], sizes = [2, 16], strides = [1, 1]} : vector<50x16xf32> to vector<2x16xf32>
    %125 = arith.truncf %124 : vector<2x16xf32> to vector<2x16xbf16>
    %c16 = arith.constant 16 : index
    %c0_77 = arith.constant 0 : index
    %c0_78 = arith.constant 0 : index
    %126 = vector.load %arg4[%c16, %c0_77, %c0_78] : memref<25x16x120xbf16, #tpu.memory_space<vmem>>, vector<1x16x120xbf16>
    %127 = vector.shape_cast %126 : vector<1x16x120xbf16> to vector<16x120xbf16>
    %cst_79 = arith.constant dense<0.000000e+00> : vector<2x120xf32>
    %128 = tpu.matmul %125, %127, %cst_79 {dimension_numbers = #tpu.dot_dimension_numbers<[1], [0], [0], [1], [0, 0, 1, 1], [], []>} : vector<2x16xbf16>, vector<16x120xbf16>, vector<2x120xf32> -> vector<2x120xf32>
    %129 = arith.addf %123, %128 : vector<2x120xf32>
    %130 = vector.extract_strided_slice %23 {offsets = [34, 0], sizes = [2, 16], strides = [1, 1]} : vector<50x16xf32> to vector<2x16xf32>
    %131 = arith.truncf %130 : vector<2x16xf32> to vector<2x16xbf16>
    %c17 = arith.constant 17 : index
    %c0_80 = arith.constant 0 : index
    %c0_81 = arith.constant 0 : index
    %132 = vector.load %arg4[%c17, %c0_80, %c0_81] : memref<25x16x120xbf16, #tpu.memory_space<vmem>>, vector<1x16x120xbf16>
    %133 = vector.shape_cast %132 : vector<1x16x120xbf16> to vector<16x120xbf16>
    %cst_82 = arith.constant dense<0.000000e+00> : vector<2x120xf32>
    %134 = tpu.matmul %131, %133, %cst_82 {dimension_numbers = #tpu.dot_dimension_numbers<[1], [0], [0], [1], [0, 0, 1, 1], [], []>} : vector<2x16xbf16>, vector<16x120xbf16>, vector<2x120xf32> -> vector<2x120xf32>
    %135 = arith.addf %129, %134 : vector<2x120xf32>
    %136 = vector.extract_strided_slice %23 {offsets = [36, 0], sizes = [2, 16], strides = [1, 1]} : vector<50x16xf32> to vector<2x16xf32>
    %137 = arith.truncf %136 : vector<2x16xf32> to vector<2x16xbf16>
    %c18 = arith.constant 18 : index
    %c0_83 = arith.constant 0 : index
    %c0_84 = arith.constant 0 : index
    %138 = vector.load %arg4[%c18, %c0_83, %c0_84] : memref<25x16x120xbf16, #tpu.memory_space<vmem>>, vector<1x16x120xbf16>
    %139 = vector.shape_cast %138 : vector<1x16x120xbf16> to vector<16x120xbf16>
    %cst_85 = arith.constant dense<0.000000e+00> : vector<2x120xf32>
    %140 = tpu.matmul %137, %139, %cst_85 {dimension_numbers = #tpu.dot_dimension_numbers<[1], [0], [0], [1], [0, 0, 1, 1], [], []>} : vector<2x16xbf16>, vector<16x120xbf16>, vector<2x120xf32> -> vector<2x120xf32>
    %141 = arith.addf %135, %140 : vector<2x120xf32>
    %142 = vector.extract_strided_slice %23 {offsets = [38, 0], sizes = [2, 16], strides = [1, 1]} : vector<50x16xf32> to vector<2x16xf32>
    %143 = arith.truncf %142 : vector<2x16xf32> to vector<2x16xbf16>
    %c19 = arith.constant 19 : index
    %c0_86 = arith.constant 0 : index
    %c0_87 = arith.constant 0 : index
    %144 = vector.load %arg4[%c19, %c0_86, %c0_87] : memref<25x16x120xbf16, #tpu.memory_space<vmem>>, vector<1x16x120xbf16>
    %145 = vector.shape_cast %144 : vector<1x16x120xbf16> to vector<16x120xbf16>
    %cst_88 = arith.constant dense<0.000000e+00> : vector<2x120xf32>
    %146 = tpu.matmul %143, %145, %cst_88 {dimension_numbers = #tpu.dot_dimension_numbers<[1], [0], [0], [1], [0, 0, 1, 1], [], []>} : vector<2x16xbf16>, vector<16x120xbf16>, vector<2x120xf32> -> vector<2x120xf32>
    %147 = arith.addf %141, %146 : vector<2x120xf32>
    %148 = vector.extract_strided_slice %23 {offsets = [40, 0], sizes = [2, 16], strides = [1, 1]} : vector<50x16xf32> to vector<2x16xf32>
    %149 = arith.truncf %148 : vector<2x16xf32> to vector<2x16xbf16>
    %c20 = arith.constant 20 : index
    %c0_89 = arith.constant 0 : index
    %c0_90 = arith.constant 0 : index
    %150 = vector.load %arg4[%c20, %c0_89, %c0_90] : memref<25x16x120xbf16, #tpu.memory_space<vmem>>, vector<1x16x120xbf16>
    %151 = vector.shape_cast %150 : vector<1x16x120xbf16> to vector<16x120xbf16>
    %cst_91 = arith.constant dense<0.000000e+00> : vector<2x120xf32>
    %152 = tpu.matmul %149, %151, %cst_91 {dimension_numbers = #tpu.dot_dimension_numbers<[1], [0], [0], [1], [0, 0, 1, 1], [], []>} : vector<2x16xbf16>, vector<16x120xbf16>, vector<2x120xf32> -> vector<2x120xf32>
    %153 = arith.addf %147, %152 : vector<2x120xf32>
    %154 = vector.extract_strided_slice %23 {offsets = [42, 0], sizes = [2, 16], strides = [1, 1]} : vector<50x16xf32> to vector<2x16xf32>
    %155 = arith.truncf %154 : vector<2x16xf32> to vector<2x16xbf16>
    %c21 = arith.constant 21 : index
    %c0_92 = arith.constant 0 : index
    %c0_93 = arith.constant 0 : index
    %156 = vector.load %arg4[%c21, %c0_92, %c0_93] : memref<25x16x120xbf16, #tpu.memory_space<vmem>>, vector<1x16x120xbf16>
    %157 = vector.shape_cast %156 : vector<1x16x120xbf16> to vector<16x120xbf16>
    %cst_94 = arith.constant dense<0.000000e+00> : vector<2x120xf32>
    %158 = tpu.matmul %155, %157, %cst_94 {dimension_numbers = #tpu.dot_dimension_numbers<[1], [0], [0], [1], [0, 0, 1, 1], [], []>} : vector<2x16xbf16>, vector<16x120xbf16>, vector<2x120xf32> -> vector<2x120xf32>
    %159 = arith.addf %153, %158 : vector<2x120xf32>
    %160 = vector.extract_strided_slice %23 {offsets = [44, 0], sizes = [2, 16], strides = [1, 1]} : vector<50x16xf32> to vector<2x16xf32>
    %161 = arith.truncf %160 : vector<2x16xf32> to vector<2x16xbf16>
    %c22 = arith.constant 22 : index
    %c0_95 = arith.constant 0 : index
    %c0_96 = arith.constant 0 : index
    %162 = vector.load %arg4[%c22, %c0_95, %c0_96] : memref<25x16x120xbf16, #tpu.memory_space<vmem>>, vector<1x16x120xbf16>
    %163 = vector.shape_cast %162 : vector<1x16x120xbf16> to vector<16x120xbf16>
    %cst_97 = arith.constant dense<0.000000e+00> : vector<2x120xf32>
    %164 = tpu.matmul %161, %163, %cst_97 {dimension_numbers = #tpu.dot_dimension_numbers<[1], [0], [0], [1], [0, 0, 1, 1], [], []>} : vector<2x16xbf16>, vector<16x120xbf16>, vector<2x120xf32> -> vector<2x120xf32>
    %165 = arith.addf %159, %164 : vector<2x120xf32>
    %166 = vector.extract_strided_slice %23 {offsets = [46, 0], sizes = [2, 16], strides = [1, 1]} : vector<50x16xf32> to vector<2x16xf32>
    %167 = arith.truncf %166 : vector<2x16xf32> to vector<2x16xbf16>
    %c23 = arith.constant 23 : index
    %c0_98 = arith.constant 0 : index
    %c0_99 = arith.constant 0 : index
    %168 = vector.load %arg4[%c23, %c0_98, %c0_99] : memref<25x16x120xbf16, #tpu.memory_space<vmem>>, vector<1x16x120xbf16>
    %169 = vector.shape_cast %168 : vector<1x16x120xbf16> to vector<16x120xbf16>
    %cst_100 = arith.constant dense<0.000000e+00> : vector<2x120xf32>
    %170 = tpu.matmul %167, %169, %cst_100 {dimension_numbers = #tpu.dot_dimension_numbers<[1], [0], [0], [1], [0, 0, 1, 1], [], []>} : vector<2x16xbf16>, vector<16x120xbf16>, vector<2x120xf32> -> vector<2x120xf32>
    %171 = arith.addf %165, %170 : vector<2x120xf32>
    %172 = vector.extract_strided_slice %23 {offsets = [48, 0], sizes = [2, 16], strides = [1, 1]} : vector<50x16xf32> to vector<2x16xf32>
    %173 = arith.truncf %172 : vector<2x16xf32> to vector<2x16xbf16>
    %c24 = arith.constant 24 : index
    %c0_101 = arith.constant 0 : index
    %c0_102 = arith.constant 0 : index
    %174 = vector.load %arg4[%c24, %c0_101, %c0_102] : memref<25x16x120xbf16, #tpu.memory_space<vmem>>, vector<1x16x120xbf16>
    %175 = vector.shape_cast %174 : vector<1x16x120xbf16> to vector<16x120xbf16>
    %cst_103 = arith.constant dense<0.000000e+00> : vector<2x120xf32>
    %176 = tpu.matmul %173, %175, %cst_103 {dimension_numbers = #tpu.dot_dimension_numbers<[1], [0], [0], [1], [0, 0, 1, 1], [], []>} : vector<2x16xbf16>, vector<16x120xbf16>, vector<2x120xf32> -> vector<2x120xf32>
    %177 = arith.addf %171, %176 : vector<2x120xf32>
    %cst_104 = arith.constant 0.000000e+00 : f32
    %178 = vector.broadcast %cst_104 : f32 to vector<2x120xf32>
    %179 = arith.maximumf %177, %178 : vector<2x120xf32>
    %180 = arith.truncf %179 : vector<2x120xf32> to vector<2x120xbf16>
    %c0_105 = arith.constant 0 : index
    %c0_106 = arith.constant 0 : index
    %181 = vector.load %arg6[%c0_105, %c0_106] : memref<120x84xbf16, #tpu.memory_space<vmem>>, vector<120x84xbf16>
    %cst_107 = arith.constant dense<0.000000e+00> : vector<2x84xf32>
    %182 = tpu.matmul %180, %181, %cst_107 {dimension_numbers = #tpu.dot_dimension_numbers<[1], [0], [0], [1], [0, 0, 1, 1], [], []>} : vector<2x120xbf16>, vector<120x84xbf16>, vector<2x84xf32> -> vector<2x84xf32>
    %c0_108 = arith.constant 0 : index
    %c0_109 = arith.constant 0 : index
    %183 = vector.load %arg7[%c0_108, %c0_109] : memref<1x84xf32, #tpu.memory_space<vmem>>, vector<1x84xf32>
    %184 = vector.broadcast %183 : vector<1x84xf32> to vector<2x84xf32>
    %185 = arith.addf %182, %184 : vector<2x84xf32>
    %cst_110 = arith.constant 0.000000e+00 : f32
    %186 = vector.broadcast %cst_110 : f32 to vector<2x84xf32>
    %187 = arith.maximumf %185, %186 : vector<2x84xf32>
    %188 = arith.truncf %187 : vector<2x84xf32> to vector<2x84xbf16>
    %c0_111 = arith.constant 0 : index
    %c0_112 = arith.constant 0 : index
    %189 = vector.load %arg8[%c0_111, %c0_112] : memref<84x10xbf16, #tpu.memory_space<vmem>>, vector<84x10xbf16>
    %cst_113 = arith.constant dense<0.000000e+00> : vector<2x10xf32>
    %190 = tpu.matmul %188, %189, %cst_113 {dimension_numbers = #tpu.dot_dimension_numbers<[1], [0], [0], [1], [0, 0, 1, 1], [], []>} : vector<2x84xbf16>, vector<84x10xbf16>, vector<2x10xf32> -> vector<2x10xf32>
    %c0_114 = arith.constant 0 : index
    %c0_115 = arith.constant 0 : index
    %191 = vector.load %arg9[%c0_114, %c0_115] : memref<1x10xf32, #tpu.memory_space<vmem>>, vector<1x10xf32>
    %192 = vector.broadcast %191 : vector<1x10xf32> to vector<2x10xf32>
    %193 = arith.addf %190, %192 : vector<2x10xf32>
    %cst_116 = arith.constant 0.000000e+00 : f32
    %194 = vector.broadcast %cst_116 : f32 to vector<2x10xf32>
    %195 = arith.maximumf %193, %194 : vector<2x10xf32>
    %c0_117 = arith.constant 0 : index
    %c0_118 = arith.constant 0 : index
    %196 = vector.load %arg10[%c0_117, %c0_118] : memref<2x10xf32, #tpu.memory_space<vmem>>, vector<2x10xf32>
    tpu.vector_store %arg10[%c0_117, %c0_118], %195 {strides = array<i32>} : memref<2x10xf32, #tpu.memory_space<vmem>>, vector<2x10xf32>,
    return
  }
  func.func @transform_0(%arg0: i32) -> (i32, i32, i32) {
    %c0_i32 = arith.constant 0 : i32
    %c0_i32_0 = arith.constant 0 : i32
    %c0_i32_1 = arith.constant 0 : i32
    %c0_i32_2 = arith.constant 0 : i32
    return %c0_i32, %c0_i32_0, %c0_i32_1 : i32, i32, i32
  }
  func.func @transform_1(%arg0: i32) -> (i32, i32) {
    %c0_i32 = arith.constant 0 : i32
    %c0_i32_0 = arith.constant 0 : i32
    %c0_i32_1 = arith.constant 0 : i32
    return %c0_i32, %c0_i32_0 : i32, i32
  }
  func.func @transform_2(%arg0: i32) -> (i32, i32) {
    %c0_i32 = arith.constant 0 : i32
    %c0_i32_0 = arith.constant 0 : i32
    %c0_i32_1 = arith.constant 0 : i32
    return %c0_i32, %c0_i32_0 : i32, i32
  }
  func.func @transform_3(%arg0: i32) -> (i32, i32, i32) {
    %c0_i32 = arith.constant 0 : i32
    %c0_i32_0 = arith.constant 0 : i32
    %c0_i32_1 = arith.constant 0 : i32
    %c0_i32_2 = arith.constant 0 : i32
    return %c0_i32, %c0_i32_0, %c0_i32_1 : i32, i32, i32
  }
  func.func @transform_4(%arg0: i32) -> (i32, i32) {
    %c0_i32 = arith.constant 0 : i32
    %c0_i32_0 = arith.constant 0 : i32
    %c0_i32_1 = arith.constant 0 : i32
    return %c0_i32, %c0_i32_0 : i32, i32
  }
  func.func @transform_5(%arg0: i32) -> (i32, i32) {
    %c0_i32 = arith.constant 0 : i32
    %c0_i32_0 = arith.constant 0 : i32
    %c0_i32_1 = arith.constant 0 : i32
    return %c0_i32, %c0_i32_0 : i32, i32
  }
  func.func @transform_6(%arg0: i32) -> (i32, i32) {
    %c0_i32 = arith.constant 0 : i32
    %c0_i32_0 = arith.constant 0 : i32
    %c0_i32_1 = arith.constant 0 : i32
    return %c0_i32, %c0_i32_0 : i32, i32
  }
  func.func @transform_7(%arg0: i32) -> (i32, i32) {
    %c0_i32 = arith.constant 0 : i32
    %c0_i32_0 = arith.constant 0 : i32
    %c0_i32_1 = arith.constant 0 : i32
    return %c0_i32, %c0_i32_0 : i32, i32
  }
  func.func @transform_8(%arg0: i32) -> (i32, i32) {
    %c0_i32 = arith.constant 0 : i32
    %c0_i32_0 = arith.constant 0 : i32
    %c0_i32_1 = arith.constant 0 : i32
    return %c0_i32, %c0_i32_0 : i32, i32
  }
  func.func @transform_9(%arg0: i32) -> (i32, i32) {
    %c0_i32 = arith.constant 0 : i32
    %c0_i32_0 = arith.constant 0 : i32
    %c0_i32_1 = arith.constant 0 : i32
    return %c0_i32, %c0_i32_0 : i32, i32
  }
}

</mosaic_0001>

<bundles_post_ra>
// kernel: lenet_forward.2
= control target key start
LH: loop header
LB: loop body
LE: loop exit
PB: predicated region body
PF: predicated region fallthrough
CT: control target
= control target key end

     0   :  { %v712_v1 = vmov 0   ;;  %vm64_vm0 = vcmask 261120   ;;  %vm586_vm1 = vcmask 1042432   ;;  %vm587_vm2 = vcmask 63492   ;;  %s868_s2 = inlined_call_operand.vmem [shape: bf16[4,32,392], index: 2, kind: input, shape index: {}]   ;;  %s869_s0 = inlined_call_operand.vmem [shape: bf16[6,32], index: 0, kind: input, shape index: {}]   ;;  %s870_s1 = inlined_call_operand.vmem [shape: f32[6,1], index: 1, kind: input, shape index: {}]   ;;  %s871_s3 = inlined_call_operand.vmem [shape: bf16[6,392], index: 3, kind: output, shape index: {}]  }
   0x1   :  { %v664_v0 = vld [vmem:[%s868_s2 + $0x4] ss:$16 sps:$4 sm:$0xff]   ;;  %100 = vmatprep.mubr.bf16.mxu0 %v712_v1  ;;  %141 = vmatprep.mubr.bf16.mxu1 %v712_v1  ;;  %v666_v2 = vld [vmem:[%s868_s2 + $0xc] ss:$16 sps:$4 sm:$0xff]   ;;  %v668_v3 = vld [vmem:[%s868_s2] ss:$16 sps:$4 sm:$0xff]  }
   0x2   :  { %663 = vset.pattern.permute.xlu0 %v712_v1  ;;  %68 = vmatprep.subr.bf16.mxu0 %v664_v0  ;;  %v669_v4 = vld [vmem:[%s868_s2 + $0x8] ss:$16 sps:$4 sm:$0xff]   ;;  %v670_v5 = vld [vmem:[%s868_s2 + $0x24] ss:$16 sps:$4 sm:$0xff]   ;;  %v672_v6 = vld [vmem:[%s868_s2 + $0x2c] ss:$16 sps:$4 sm:$0xff]  }
   0x3   :  { %109 = vmatprep.subr.bf16.mxu1 %v666_v2  ;;  %69 = vmatpush1.bf16.msra.mxu0 %v668_v3  ;;  %v674_v7 = vld [vmem:[%s868_s2 + $0x20] ss:$16 sps:$4 sm:$0xff]   ;;  %v675_v8 = vld [vmem:[%s868_s2 + $0x28] ss:$16 sps:$4 sm:$0xff]   ;;  %v678_v11 = vld [vmem:[%s868_s2 + $0x44] ss:$16 sps:$4 sm:$0xff]  }
   0x4   :  { %110 = vmatpush1.bf16.msra.mxu1 %v669_v4  ;;  %70 = vmatprep.subr.bf16.mxu0 %v670_v5  ;;  %v763_v9 = vld [vmem:[%s869_s0] sm:$0x7]  ;;  %v679_v12 = vld [vmem:[%s868_s2 + $0x48] ss:$16 sps:$4 sm:$0xff]   ;;  %v681_v13 = vld [vmem:[%s868_s2 + $0x4c] ss:$16 sps:$4 sm:$0xff]  }
   0x5   :  { %111 = vmatprep.subr.bf16.mxu1 %v672_v6  ;;  %v676_v10 = vld [vmem:[%s868_s2 + $0x40] ss:$16 sps:$4 sm:$0xff]   ;;  %v684_v14 = vld [vmem:[%s868_s2 + $0x64] ss:$16 sps:$4 sm:$0xff]   ;;  %v687_v15 = vld [vmem:[%s868_s2 + $0x6c] ss:$16 sps:$4 sm:$0xff]  }
   0x6   :  { %v682_v16 = vld [vmem:[%s868_s2 + $0x60] ss:$16 sps:$4 sm:$0xff]   ;;  %v685_v17 = vld [vmem:[%s868_s2 + $0x68] ss:$16 sps:$4 sm:$0xff]   ;;  %v690_v18 = vld [vmem:[%s868_s2 + $0x84] ss:$16 sps:$4 sm:$0xff]  }
   0x7   :  { %71 = vmatpush1.bf16.msra.mxu0 %v674_v7  ;;  %v693_v19 = vld [vmem:[%s868_s2 + $0x8c] ss:$16 sps:$4 sm:$0xff]   ;;  %v688_v20 = vld [vmem:[%s868_s2 + $0x80] ss:$16 sps:$4 sm:$0xff]   ;;  %v691_v21 = vld [vmem:[%s868_s2 + $0x88] ss:$16 sps:$4 sm:$0xff]  }
   0x8   :  { %112 = vmatpush1.bf16.msra.mxu1 %v675_v8  ;;  %199 = vmatprep.subr.bf16.mxu0 %v678_v11  ;;  %v696_v22 = vld [vmem:[%s868_s2 + $0xa4] ss:$16 sps:$4 sm:$0xff]   ;;  %v699_v23 = vld [vmem:[%s868_s2 + $0xac] ss:$16 sps:$4 sm:$0xff]   ;;  %v694_v24 = vld [vmem:[%s868_s2 + $0xa0] ss:$16 sps:$4 sm:$0xff]  }
   0x9   :  { %240 = vmatprep.subr.bf16.mxu1 %v681_v13  ;;  %v697_v25 = vld [vmem:[%s868_s2 + $0xa8] ss:$16 sps:$4 sm:$0xff]   ;;  %v702_v26 = vld [vmem:[%s868_s2 + $0xc4] ss:$16 sps:$4 sm:$0xff]   ;;  %v705_v27 = vld [vmem:[%s868_s2 + $0xcc] ss:$16 sps:$4 sm:$0xff]  }
   0xa   :  { %602 = vmatmul.mubr.msk.bf16.vlgmr.msra.gmra.mrb[0].mxu0 %vm64_vm0, %v763_v9  ;;  %v555_v28 = vld [vmem:[%s870_s1] sm:$0x3f]  ;;  %v703_v30 = vld [vmem:[%s868_s2 + $0xc8] ss:$16 sps:$4 sm:$0xff]   ;;  %v711_v32 = vld [vmem:[%s868_s2 + $0xec] ss:$16 sps:$4 sm:$0xff]  }
   0xb   :  { %603 = vmatmul.mubr.msk.bf16.vlgmr.msra.gmra.mrb[0].mxu1 %vm64_vm0, %v763_v9  ;;  %200 = vmatpush1.bf16.msra.mxu0 %v676_v10  ;;  %v700_v29 = vld [vmem:[%s868_s2 + $0xc0] ss:$16 sps:$4 sm:$0xff]   ;;  %v708_v31 = vld [vmem:[%s868_s2 + $0xe4] ss:$16 sps:$4 sm:$0xff]   ;;  %v709_v34 = vld [vmem:[%s868_s2 + $0xe8] ss:$16 sps:$4 sm:$0xff]  }
   0xc   :  { %241 = vmatpush1.bf16.msra.mxu1 %v679_v12  ;;  %201 = vmatprep.subr.bf16.mxu0 %v684_v14  ;;  %v706_v33 = vld [vmem:[%s868_s2 + $0xe0] ss:$16 sps:$4 sm:$0xff]   ;;  %vm588_vm3 = vmor %vm587_vm2, %vm586_vm1 }
   0xd   :  { %242 = vmatprep.subr.bf16.mxu1 %v687_v15  ;;  %231 = vmatprep.mubr.bf16.mxu0 %v712_v1 }
   0xe   :  { %272 = vmatprep.mubr.bf16.mxu1 %v712_v1  ;;  %558 = vperm.xlu0 %663, %v555_v28  }
   0xf   :  { %202 = vmatpush1.bf16.msra.mxu0 %v682_v16 }
  0x10   :  { %243 = vmatpush1.bf16.msra.mxu1 %v685_v17  ;;  %334 = vmatprep.subr.bf16.mxu0 %v690_v18 }
  0x11   :  { %375 = vmatprep.subr.bf16.mxu1 %v693_v19 }
  0x12   :  { %620 = vmatmul.mubr.msk.bf16.vlgmr.msra.gmra.mrb[4].mxu0 %vm64_vm0, %v763_v9 }
  0x13   :  { %621 = vmatmul.mubr.msk.bf16.vlgmr.msra.gmra.mrb[4].mxu1 %vm64_vm0, %v763_v9  ;;  %335 = vmatpush1.bf16.msra.mxu0 %v688_v20 }
  0x14   :  { %376 = vmatpush1.bf16.msra.mxu1 %v691_v21  ;;  %336 = vmatprep.subr.bf16.mxu0 %v696_v22 }
  0x15   :  { %377 = vmatprep.subr.bf16.mxu1 %v699_v23  ;;  %366 = vmatprep.mubr.bf16.mxu0 %v712_v1 }
  0x16   :  { %407 = vmatprep.mubr.bf16.mxu1 %v712_v1 }
  0x17   :  { %337 = vmatpush1.bf16.msra.mxu0 %v694_v24 }
  0x18   :  { %378 = vmatpush1.bf16.msra.mxu1 %v697_v25  ;;  %465 = vmatprep.subr.bf16.mxu0 %v702_v26 }
  0x19   :  { %506 = vmatprep.subr.bf16.mxu1 %v705_v27 }
  0x1a   :  { %638 = vmatmul.mubr.msk.bf16.vlgmr.msra.gmra.mrb[8].mxu0 %vm64_vm0, %v763_v9 }
  0x1b   :  { %639 = vmatmul.mubr.msk.bf16.vlgmr.msra.gmra.mrb[8].mxu1 %vm64_vm0, %v763_v9  ;;  %466 = vmatpush1.bf16.msra.mxu0 %v700_v29 }
  0x1c   :  { %507 = vmatpush1.bf16.msra.mxu1 %v703_v30  ;;  %467 = vmatprep.subr.bf16.mxu0 %v708_v31 }
  0x1d   :  { %508 = vmatprep.subr.bf16.mxu1 %v711_v32  ;;  %497 = vmatprep.mubr.bf16.mxu0 %v712_v1 }
  0x1e   :  { %538 = vmatprep.mubr.bf16.mxu1 %v712_v1 }
  0x1f   :  { %468 = vmatpush1.bf16.msra.mxu0 %v706_v33 }
  0x20   :  { %509 = vmatpush1.bf16.msra.mxu1 %v709_v34 }
  0x22   :  { %656 = vmatmul.mubr.msk.bf16.vlgmr.msra.gmra.mrb[12].mxu0 %vm64_vm0, %v763_v9 }
  0x23   :  { %657 = vmatmul.mubr.msk.bf16.vlgmr.msra.gmra.mrb[12].mxu1 %vm64_vm0, %v763_v9 }
  0x8d   :  { %v559_v63 = vpop.permute.xlu0 %558 }
  0xdd   :  { %v102_v35 = vpop.f32.mrb[0].mxu0 }
  0xde   :  { %v143_v36 = vpop.f32.mrb[0].mxu1  ;;  %v104_v37 = vpop.f32.mrb[1].mxu0 }
  0xdf   :  { %v145_v38 = vpop.f32.mrb[1].mxu1  ;;  %v106_v39 = vpop.f32.mrb[2].mxu0 }
  0xe0   :  { %v147_v40 = vpop.f32.mrb[2].mxu1  ;;  %v107_v41 = vpop.f32.mrb[3].mxu0 }
  0xe1   :  { %v148_v42 = vpop.f32.mrb[3].mxu1 }
  0xe5   :  { %v233_v43 = vpop.f32.mrb[4].mxu0 }
  0xe6   :  { %v274_v44 = vpop.f32.mrb[4].mxu1  ;;  %v281_v45 = vmax.f32 %v102_v35, %v233_v43  ;;  %v235_v47 = vpop.f32.mrb[5].mxu0 }
  0xe7   :  { %v283_v46 = vmax.f32 %v143_v36, %v274_v44  ;;  %v276_v48 = vpop.f32.mrb[5].mxu1  ;;  %v282_v49 = vmax.f32 %v104_v37, %v235_v47  ;;  %v237_v51 = vpop.f32.mrb[6].mxu0 }
  0xe8   :  { %v284_v50 = vmax.f32 %v145_v38, %v276_v48  ;;  %v278_v52 = vpop.f32.mrb[6].mxu1  ;;  %v238_v53 = vpop.f32.mrb[7].mxu0 }
  0xe9   :  { %v279_v54 = vpop.f32.mrb[7].mxu1 }
  0xed   :  { %v368_v55 = vpop.f32.mrb[8].mxu0 }
  0xee   :  { %v409_v56 = vpop.f32.mrb[8].mxu1  ;;  %v370_v57 = vpop.f32.mrb[9].mxu0 }
  0xef   :  { %v411_v58 = vpop.f32.mrb[9].mxu1  ;;  %v372_v59 = vpop.f32.mrb[10].mxu0 }
  0xf0   :  { %v413_v60 = vpop.f32.mrb[10].mxu1  ;;  %v373_v61 = vpop.f32.mrb[11].mxu0 }
  0xf1   :  { %v414_v62 = vpop.f32.mrb[11].mxu1 }
  0xf5   :  { %v499_v0 = vpop.f32.mrb[12].mxu0 }
  0xf6   :  { %v540_v1 = vpop.f32.mrb[12].mxu1  ;;  %v547_v2 = vmax.f32 %v368_v55, %v499_v0  ;;  %v501_v4 = vpop.f32.mrb[13].mxu0 }
  0xf7   :  { %v549_v3 = vmax.f32 %v409_v56, %v540_v1  ;;  %v542_v5 = vpop.f32.mrb[13].mxu1  ;;  %v548_v6 = vmax.f32 %v370_v57, %v501_v4  ;;  %v503_v8 = vpop.f32.mrb[14].mxu0 }
  0xf8   :  { %v550_v7 = vmax.f32 %v411_v58, %v542_v5  ;;  %v544_v9 = vpop.f32.mrb[14].mxu1  ;;  %v551_v10 = vmax.f32 %v281_v45, %v547_v2  ;;  %v504_v12 = vpop.f32.mrb[15].mxu0 }
  0xf9   :  { %v553_v11 = vmax.f32 %v283_v46, %v549_v3  ;;  %v545_v13 = vpop.f32.mrb[15].mxu1  ;;  %v552_v14 = vmax.f32 %v282_v49, %v548_v6 }
  0xfa   :  { %v554_v15 = vmax.f32 %v284_v50, %v550_v7  ;;  %v561_v16 = vadd.f32 %v559_v63, %v551_v10 }
  0xfb   :  { %v563_v17 = vadd.f32 %v559_v63, %v553_v11  ;;  %v562_v18 = vadd.f32 %v559_v63, %v552_v14 }
  0xfc   :  { %v564_v19 = vadd.f32 %v559_v63, %v554_v15  ;;  %v565_v20 = vmax.f32 %v561_v16, 0.0 }
  0xfd   :  { %v567_v21 = vmax.f32 %v563_v17, 0.0  ;;  %v566_v22 = vmax.f32 %v562_v18, 0.0 }
  0xfe   :  { %v568_v23 = vmax.f32 %v564_v19, 0.0 }
  0xff   :  { %v660_v24 = vpack.c.bf16 %v566_v22, %v565_v20 }
 0x100   :  { %v661_v25 = vpack.c.bf16 %v568_v23, %v567_v21 }
 0x101   :  { %585 = vst [vmem:[%s871_s3] sm:$0x77] %v660_v24 }
 0x102   :  { %589 = vst.msk [vmem:[%s871_s3 + $0x8] sm:$0x77] %vm588_vm3, %v661_v25 }

// kernel: lenet_forward.3
= control target key start
LH: loop header
LB: loop body
LE: loop exit
PB: predicated region body
PF: predicated region fallthrough
CT: control target
= control target key end

     0   :  { %v2889_v1 = vmov 0   ;;  %vm150_vm0 = vcmask 195584   ;;  %vm163_vm1 = vcmask 1043456   ;;  %s3476_s0 = inlined_call_operand.vmem [shape: bf16[4,50,152], index: 0, kind: input, shape index: {}]   ;;  %s3477_s1 = inlined_call_operand.vmem [shape: bf16[152,16], index: 1, kind: input, shape index: {}]   ;;  %s3478_s2 = inlined_call_operand.vmem [shape: f32[1,16], index: 2, kind: input, shape index: {}]   ;;  %s3479_s3 = inlined_call_operand.vmem [shape: bf16[25,16,120], index: 3, kind: input, shape index: {}]   ;;  %s3480_s4 = inlined_call_operand.vmem [shape: f32[1,120], index: 4, kind: input, shape index: {}]   ;;  %s3481_s5 = inlined_call_operand.vmem [shape: bf16[120,84], index: 5, kind: input, shape index: {}]   ;;  %s3482_s6 = inlined_call_operand.vmem [shape: f32[1,84], index: 6, kind: input, shape index: {}]   ;;  %s3483_s7 = inlined_call_operand.vmem [shape: bf16[84,10], index: 7, kind: input, shape index: {}]   ;;  %s3484_s8 = inlined_call_operand.vmem [shape: f32[1,10], index: 8, kind: input, shape index: {}]   ;;  %s3485_s9 = inlined_call_operand.hbm [shape: f32[2,10], index: 9, kind: output, shape index: {}]  }
   0x1   :  { %v2946_v0 = vld [vmem:[%s3477_s1] sm:$0xff]   ;;  %167 = vmatprep.subr.bf16.mxu1 %v2889_v1  ;;  %v2953_v2 = vld [vmem:[%s3477_s1 + $0x8] sm:$0xff]   ;;  %v2960_v3 = vld [vmem:[%s3477_s1 + $0x10] sm:$0xff]  }
   0x2   :  { %168 = vmatpush1.bf16.msra.mxu1 %v2946_v0  ;;  %v2967_v4 = vld [vmem:[%s3477_s1 + $0x18] sm:$0xff]   ;;  %v2784_v5 = vld [vmem:[%s3476_s0 + $0x4] ss:$8 sps:$4 sm:$0xff]   ;;  %v2992_v8 = vld [vmem:[%s3477_s1 + $0x30] sm:$0xff]  }
   0x3   :  { %169 = vmatprep.subr.bf16.mxu1 %v2889_v1  ;;  %2240 = vmatprep.mubr.msk.bf16.mxu1 %vm150_vm0, %v2784_v5  ;;  %v2978_v6 = vld [vmem:[%s3477_s1 + $0x20] sm:$0xff]   ;;  %v2985_v7 = vld [vmem:[%s3477_s1 + $0x28] sm:$0xff]   ;;  %v2998_v9 = vld [vmem:[%s3477_s1 + $0x38] sm:$0xff]  }
   0x4   :  { %v3006_v10 = vld [vmem:[%s3477_s1 + $0x40] sm:$0xff]   ;;  %v2781_v11 = vld [vmem:[%s3477_s1 + $0x48] ss:$0 sps:$4 sm:$0xff]   ;;  %v2785_v14 = vld [vmem:[%s3476_s0 + $0x14] ss:$8 sps:$4 sm:$0xff]  }
   0x5   :  { %v3014_v12 = vsel %vm163_vm1, %v2781_v11, 0  ;;  %v2782_v13 = vld [vmem:[%s3476_s0] ss:$8 sps:$4 sm:$0xff]   ;;  %v2787_v15 = vld [vmem:[%s3476_s0 + $0x10] ss:$8 sps:$4 sm:$0xff]  }
   0x6   :  { %170 = vmatpush1.bf16.msra.mxu1 %v2953_v2  ;;  %v2788_v16 = vld [vmem:[%s3476_s0 + $0x24] ss:$8 sps:$4 sm:$0xff]   ;;  %v40_v17 = vld [vmem:[%s3476_s0 + $0x30] sm:$0x11] }
   0x7   :  { %171 = vmatprep.subr.bf16.mxu1 %v2889_v1 }
   0xa   :  { %172 = vmatpush1.bf16.msra.mxu1 %v2960_v3 }
   0xb   :  { %173 = vmatprep.subr.bf16.mxu1 %v2889_v1 }
   0xe   :  { %174 = vmatpush1.bf16.msra.mxu1 %v2967_v4 }
   0xf   :  { %175 = vmatprep.subr.bf16.mxu1 %v2889_v1 }
  0x12   :  { %176 = vmatpush1.bf16.msra.mxu1 %v2978_v6 }
  0x13   :  { %177 = vmatprep.subr.bf16.mxu1 %v2889_v1 }
  0x16   :  { %178 = vmatpush1.bf16.msra.mxu1 %v2985_v7 }
  0x17   :  { %179 = vmatprep.subr.bf16.mxu1 %v2889_v1 }
  0x1a   :  { %180 = vmatpush1.bf16.msra.mxu1 %v2992_v8 }
  0x1b   :  { %181 = vmatprep.subr.bf16.mxu1 %v2889_v1 }
  0x1e   :  { %182 = vmatpush1.bf16.msra.mxu1 %v2998_v9 }
  0x1f   :  { %183 = vmatprep.subr.bf16.mxu1 %v2889_v1 }
  0x22   :  { %184 = vmatpush1.bf16.msra.mxu1 %v3006_v10 }
  0x23   :  { %185 = vmatprep.subr.bf16.mxu1 %v2889_v1 }
  0x26   :  { %186 = vmatpush1.bf16.msra.mxu1 %v3014_v12 }
  0x27   :  { %284 = vmatprep.subr.bf16.mxu1 %v2889_v1 }
  0x29   :  { %200 = vmatmul.mubr.bf16.vlgmr.msra.gmra.mrb[0].mxu1 %v2782_v13 }
  0x2a   :  { %285 = vmatpush1.bf16.msra.mxu1 %v2946_v0  ;;  %2241 = vmatprep.mubr.msk.bf16.mxu1 %vm150_vm0, %v2785_v14 }
  0x2b   :  { %286 = vmatprep.subr.bf16.mxu1 %v2889_v1 }
  0x2e   :  { %287 = vmatpush1.bf16.msra.mxu1 %v2953_v2 }
  0x2f   :  { %288 = vmatprep.subr.bf16.mxu1 %v2889_v1 }
  0x31   :  { %208 = vmatmul.mubr.bf16.gmra.mrb[4].mxu1 %v2787_v15 }
  0x32   :  { %289 = vmatpush1.bf16.msra.mxu1 %v2960_v3  ;;  %2242 = vmatprep.mubr.msk.bf16.mxu1 %vm150_vm0, %v2788_v16 }
  0x33   :  { %290 = vmatprep.subr.bf16.mxu1 %v2889_v1 }
  0x34   :  { %14 = vsyncpa [#allocation3], 0  ;;  %v2790_v18 = vld [vmem:[%s3476_s0 + $0x20] ss:$8 sps:$4 sm:$0xff]   ;;  %v2229_v19 = vcombine.high %v40_v17, %v40_v17  ;;  %v2228_v20 = vcombine.low %v40_v17, %v40_v17  ;;  %v2795_v21 = vld [vmem:[%s3476_s0 + $0x3c] ss:$8 sps:$4 sm:$0xff]  }
  0x35   :  { %v2793_v22 = vld [vmem:[%s3476_s0 + $0x38] ss:$8 sps:$4 sm:$0xff]   ;;  %v2796_v23 = vld [vmem:[%s3476_s0 + $0x4c] ss:$8 sps:$4 sm:$0xff]   ;;  %v2798_v24 = vld [vmem:[%s3476_s0 + $0x48] ss:$8 sps:$4 sm:$0xff]  }
  0x36   :  { %291 = vmatpush1.bf16.msra.mxu1 %v2967_v4  ;;  %v2799_v25 = vld [vmem:[%s3476_s0 + $0x5c] ss:$8 sps:$4 sm:$0xff]   ;;  %v2250_v26 = vld [vmem:[%s3476_s0 + $0x68] sm:$0x11]  ;;  %v2801_v27 = vld [vmem:[%s3476_s0 + $0x58] ss:$8 sps:$4 sm:$0xff]  }
  0x37   :  { %292 = vmatprep.subr.bf16.mxu1 %v2889_v1  ;;  %v2258_v28 = vcombine.high %v2250_v26, %v2250_v26  ;;  %v2257_v29 = vcombine.low %v2250_v26, %v2250_v26  ;;  %v2806_v30 = vld [vmem:[%s3476_s0 + $0x74] ss:$8 sps:$4 sm:$0xff]   ;;  %v2804_v31 = vld [vmem:[%s3476_s0 + $0x70] ss:$8 sps:$4 sm:$0xff]   ;;  %v2807_v32 = vld [vmem:[%s3476_s0 + $0x84] ss:$8 sps:$4 sm:$0xff]  }
  0x38   :  { %v2809_v33 = vld [vmem:[%s3476_s0 + $0x80] ss:$8 sps:$4 sm:$0xff]   ;;  %v2810_v34 = vld [vmem:[%s3476_s0 + $0x94] ss:$8 sps:$4 sm:$0xff]   ;;  %v2812_v36 = vld [vmem:[%s3476_s0 + $0x90] ss:$8 sps:$4 sm:$0xff]  }
  0x39   :  { %216 = vmatmul.mubr.bf16.gmra.mrb[8].mxu1 %v2790_v18  ;;  %v2269_v35 = vld [vmem:[%s3476_s0 + $0xa0] sm:$0x11]  ;;  %v2817_v39 = vld [vmem:[%s3476_s0 + $0xac] ss:$8 sps:$4 sm:$0xff]   ;;  %v2815_v40 = vld [vmem:[%s3476_s0 + $0xa8] ss:$8 sps:$4 sm:$0xff]  }
  0x3a   :  { %293 = vmatpush1.bf16.msra.mxu1 %v2978_v6  ;;  %2243 = vmatprep.mubr.msk.bf16.mxu1 %vm150_vm0, %v2229_v19  ;;  %v2277_v37 = vcombine.high %v2269_v35, %v2269_v35  ;;  %v2276_v38 = vcombine.low %v2269_v35, %v2269_v35  ;;  %v2818_v41 = vld [vmem:[%s3476_s0 + $0xbc] ss:$8 sps:$4 sm:$0xff]   ;;  %v2820_v42 = vld [vmem:[%s3476_s0 + $0xb8] ss:$8 sps:$4 sm:$0xff]   ;;  %v2821_v43 = vld [vmem:[%s3476_s0 + $0xcc] ss:$8 sps:$4 sm:$0xff]  }
  0x3b   :  { %294 = vmatprep.subr.bf16.mxu1 %v2889_v1  ;;  %v2288_v44 = vld [vmem:[%s3476_s0 + $0xd8] sm:$0x11]  ;;  %v2823_v45 = vld [vmem:[%s3476_s0 + $0xc8] ss:$8 sps:$4 sm:$0xff]   ;;  %v2826_v48 = vld [vmem:[%s3479_s3] sm:$0xff]   ;;  %v2890_v49 = vmov 0.0  }
  0x3c   :  { %v2296_v46 = vcombine.high %v2288_v44, %v2288_v44  ;;  %v2295_v47 = vcombine.low %v2288_v44, %v2288_v44  ;;  %2485 = vmatprep.subr.bf16.mxu0 %v2890_v49  ;;  %vm2891_vm2 = vmmov 0   ;;  %v2301_v44 = vld [vmem:[%s3478_s2] ss:$0 sm:$0xff]  ;;  %vm641_vm3 = vcmask 130048  }
  0x3d   :  { %2486 = vmatpush3.bf16.msra.mxu0 %v2826_v48  ;;  %2487 = vmatprep.mubr.msk.bf16.mxu0 %vm2891_vm2, %v2890_v49  ;;  %vm2057_vm4 = vcmask 982016   ;;  %vm2161_vm5 = vcmask 1041408   ;;  %vm2157_vm6 = vcmask 687104   ;;  %vm2206_vm7 = vcmask 74752  }
  0x3e   :  { %295 = vmatpush1.bf16.msra.mxu1 %v2985_v7  ;;  %2491 = vmatprep.subr.bf16.mxu0 %v2890_v49 }
  0x3f   :  { %296 = vmatprep.subr.bf16.mxu1 %v2889_v1 }
  0x41   :  { %224 = vmatmul.mubr.bf16.gmra.mrb[12].mxu1 %v2228_v20 }
  0x42   :  { %297 = vmatpush1.bf16.msra.mxu1 %v2992_v8  ;;  %2259 = vmatprep.mubr.msk.bf16.mxu1 %vm150_vm0, %v2795_v21 }
  0x43   :  { %298 = vmatprep.subr.bf16.mxu1 %v2889_v1 }
  0x46   :  { %299 = vmatpush1.bf16.msra.mxu1 %v2998_v9 }
  0x47   :  { %300 = vmatprep.subr.bf16.mxu1 %v2889_v1 }
  0x4a   :  { %301 = vmatpush1.bf16.msra.mxu1 %v3006_v10 }
  0x4b   :  { %302 = vmatprep.subr.bf16.mxu1 %v2889_v1 }
  0x4e   :  { %303 = vmatpush1.bf16.msra.mxu1 %v3014_v12 }
  0x4f   :  { %408 = vmatprep.subr.bf16.mxu1 %v2889_v1 }
  0x51   :  { %317 = vmatmul.mubr.bf16.vlgmr.msra.gmra.mrb[16].mxu1 %v2793_v22 }
  0x52   :  { %409 = vmatpush1.bf16.msra.mxu1 %v2946_v0  ;;  %2260 = vmatprep.mubr.msk.bf16.mxu1 %vm150_vm0, %v2796_v23 }
  0x53   :  { %410 = vmatprep.subr.bf16.mxu1 %v2889_v1 }
  0x56   :  { %411 = vmatpush1.bf16.msra.mxu1 %v2953_v2 }
  0x57   :  { %412 = vmatprep.subr.bf16.mxu1 %v2889_v1 }
  0x59   :  { %325 = vmatmul.mubr.bf16.gmra.mrb[20].mxu1 %v2798_v24 }
  0x5a   :  { %413 = vmatpush1.bf16.msra.mxu1 %v2960_v3  ;;  %2261 = vmatprep.mubr.msk.bf16.mxu1 %vm150_vm0, %v2799_v25 }
  0x5b   :  { %414 = vmatprep.subr.bf16.mxu1 %v2889_v1 }
  0x5e   :  { %415 = vmatpush1.bf16.msra.mxu1 %v2967_v4 }
  0x5f   :  { %416 = vmatprep.subr.bf16.mxu1 %v2889_v1 }
  0x61   :  { %333 = vmatmul.mubr.bf16.gmra.mrb[24].mxu1 %v2801_v27 }
  0x62   :  { %417 = vmatpush1.bf16.msra.mxu1 %v2978_v6  ;;  %2262 = vmatprep.mubr.msk.bf16.mxu1 %vm150_vm0, %v2258_v28 }
  0x63   :  { %418 = vmatprep.subr.bf16.mxu1 %v2889_v1 }
  0x66   :  { %419 = vmatpush1.bf16.msra.mxu1 %v2985_v7 }
  0x67   :  { %420 = vmatprep.subr.bf16.mxu1 %v2889_v1 }
  0x69   :  { %341 = vmatmul.mubr.bf16.gmra.mrb[28].mxu1 %v2257_v29 }
  0x6a   :  { %421 = vmatpush1.bf16.msra.mxu1 %v2992_v8  ;;  %2278 = vmatprep.mubr.msk.bf16.mxu1 %vm150_vm0, %v2806_v30 }
  0x6b   :  { %422 = vmatprep.subr.bf16.mxu1 %v2889_v1 }
  0x6e   :  { %423 = vmatpush1.bf16.msra.mxu1 %v2998_v9 }
  0x6f   :  { %424 = vmatprep.subr.bf16.mxu1 %v2889_v1 }
  0x72   :  { %425 = vmatpush1.bf16.msra.mxu1 %v3006_v10 }
  0x73   :  { %426 = vmatprep.subr.bf16.mxu1 %v2889_v1 }
  0x76   :  { %427 = vmatpush1.bf16.msra.mxu1 %v3014_v12 }
  0x77   :  { %525 = vmatprep.subr.bf16.mxu1 %v2889_v1 }
  0x79   :  { %441 = vmatmul.mubr.bf16.vlgmr.msra.gmra.mrb[32].mxu1 %v2804_v31 }
  0x7a   :  { %526 = vmatpush1.bf16.msra.mxu1 %v2946_v0  ;;  %2279 = vmatprep.mubr.msk.bf16.mxu1 %vm150_vm0, %v2807_v32 }
  0x7b   :  { %527 = vmatprep.subr.bf16.mxu1 %v2889_v1 }
  0x7e   :  { %528 = vmatpush1.bf16.msra.mxu1 %v2953_v2 }
  0x7f   :  { %529 = vmatprep.subr.bf16.mxu1 %v2889_v1 }
  0x81   :  { %449 = vmatmul.mubr.bf16.gmra.mrb[36].mxu1 %v2809_v33 }
  0x82   :  { %530 = vmatpush1.bf16.msra.mxu1 %v2960_v3  ;;  %2280 = vmatprep.mubr.msk.bf16.mxu1 %vm150_vm0, %v2810_v34 }
  0x83   :  { %531 = vmatprep.subr.bf16.mxu1 %v2889_v1 }
  0x86   :  { %532 = vmatpush1.bf16.msra.mxu1 %v2967_v4 }
  0x87   :  { %533 = vmatprep.subr.bf16.mxu1 %v2889_v1 }
  0x89   :  { %457 = vmatmul.mubr.bf16.gmra.mrb[40].mxu1 %v2812_v36 }
  0x8a   :  { %534 = vmatpush1.bf16.msra.mxu1 %v2978_v6  ;;  %2281 = vmatprep.mubr.msk.bf16.mxu1 %vm150_vm0, %v2277_v37 }
  0x8b   :  { %535 = vmatprep.subr.bf16.mxu1 %v2889_v1 }
  0x8e   :  { %536 = vmatpush1.bf16.msra.mxu1 %v2985_v7 }
  0x8f   :  { %537 = vmatprep.subr.bf16.mxu1 %v2889_v1 }
  0x91   :  { %465 = vmatmul.mubr.bf16.gmra.mrb[44].mxu1 %v2276_v38 }
  0x92   :  { %538 = vmatpush1.bf16.msra.mxu1 %v2992_v8  ;;  %2297 = vmatprep.mubr.msk.bf16.mxu1 %vm150_vm0, %v2817_v39 }
  0x93   :  { %539 = vmatprep.subr.bf16.mxu1 %v2889_v1 }
  0x96   :  { %540 = vmatpush1.bf16.msra.mxu1 %v2998_v9 }
  0x97   :  { %541 = vmatprep.subr.bf16.mxu1 %v2889_v1 }
  0x9a   :  { %542 = vmatpush1.bf16.msra.mxu1 %v3006_v10 }
  0x9b   :  { %543 = vmatprep.subr.bf16.mxu1 %v2889_v1 }
  0x9e   :  { %544 = vmatpush1.bf16.msra.mxu1 %v3014_v12 }
  0x9f   :  { %2635 = vmatprep.subr.bf16.mxu1 %v2890_v49 }
  0xa1   :  { %558 = vmatmul.mubr.bf16.vlgmr.msra.gmra.mrb[48].mxu1 %v2815_v40 }
  0xa2   :  { %2298 = vmatprep.mubr.msk.bf16.mxu1 %vm150_vm0, %v2818_v41 }
  0xa9   :  { %566 = vmatmul.mubr.bf16.gmra.mrb[52].mxu1 %v2820_v42 }
  0xaa   :  { %2299 = vmatprep.mubr.msk.bf16.mxu1 %vm150_vm0, %v2821_v43 }
  0xb1   :  { %574 = vmatmul.mubr.bf16.gmra.mrb[56].mxu1 %v2823_v45 }
  0xb2   :  { %2300 = vmatprep.mubr.msk.bf16.mxu1 %vm150_vm0, %v2296_v46 }
  0xb9   :  { %582 = vmatmul.mubr.bf16.gmra.mrb[60].mxu1 %v2295_v47 }
  0xba   :  { %2651 = vmatprep.mubr.msk.bf16.mxu1 %vm2891_vm2, %v2890_v49 }
  0xfc   :  { %v3179_v50 = vpop.f32.mrb[0].mxu1 }
  0xfd   :  { %v203_v51 = vpop.f32.mrb[1].mxu1 }
  0xfe   :  { %v3182_v52 = vpop.f32.mrb[2].mxu1 }
  0xff   :  { %v206_v53 = vpop.f32.mrb[3].mxu1 }
 0x104   :  { %v3188_v54 = vpop.f32.mrb[4].mxu1 }
 0x105   :  { %v211_v55 = vpop.f32.mrb[5].mxu1 }
 0x106   :  { %v3190_v56 = vpop.f32.mrb[6].mxu1 }
 0x107   :  { %v214_v57 = vpop.f32.mrb[7].mxu1 }
 0x10c   :  { %v3192_v58 = vpop.f32.mrb[8].mxu1 }
 0x10d   :  { %v219_v59 = vpop.f32.mrb[9].mxu1 }
 0x10e   :  { %v3194_v60 = vpop.f32.mrb[10].mxu1 }
 0x10f   :  { %v222_v61 = vpop.f32.mrb[11].mxu1 }
 0x114   :  { %v3196_v62 = vpop.f32.mrb[12].mxu1 }
 0x115   :  { %v227_v63 = vpop.f32.mrb[13].mxu1 }
 0x116   :  { %v228_v0 = vpop.f32.mrb[14].mxu1 }
 0x117   :  { %v229_v1 = vpop.f32.mrb[15].mxu1 }
 0x124   :  { %v318_v2 = vpop.f32.mrb[16].mxu1 }
 0x125   :  { %v348_v3 = vmax.f32 %v3179_v50, %v318_v2  ;;  %v320_v4 = vpop.f32.mrb[17].mxu1 }
 0x126   :  { %v321_v5 = vpop.f32.mrb[18].mxu1 }
 0x127   :  { %v349_v6 = vmax.f32 %v3182_v52, %v321_v5  ;;  %v323_v7 = vpop.f32.mrb[19].mxu1 }
 0x12c   :  { %v326_v8 = vpop.f32.mrb[20].mxu1 }
 0x12d   :  { %v350_v9 = vmax.f32 %v3188_v54, %v326_v8  ;;  %v328_v10 = vpop.f32.mrb[21].mxu1  ;;  %v2827_v54 = vld [vmem:[%s3479_s3 + $0x8] sm:$0xff]  }
 0x12e   :  { %v329_v11 = vpop.f32.mrb[22].mxu1 }
 0x12f   :  { %v351_v12 = vmax.f32 %v3190_v56, %v329_v11  ;;  %v331_v13 = vpop.f32.mrb[23].mxu1 }
 0x134   :  { %v334_v14 = vpop.f32.mrb[24].mxu1 }
 0x135   :  { %v352_v15 = vmax.f32 %v3192_v58, %v334_v14  ;;  %v336_v16 = vpop.f32.mrb[25].mxu1 }
 0x136   :  { %v337_v17 = vpop.f32.mrb[26].mxu1 }
 0x137   :  { %v353_v18 = vmax.f32 %v3194_v60, %v337_v17  ;;  %v339_v19 = vpop.f32.mrb[27].mxu1 }
 0x13c   :  { %v3204_v20 = vpop.f32.mrb[28].mxu1 }
 0x13d   :  { %v354_v21 = vmax.f32 %v3196_v62, %v3204_v20  ;;  %v344_v22 = vpop.f32.mrb[29].mxu1  ;;  %v2830_v62 = vld [vmem:[%s3479_s3 + $0x20] sm:$0xff]  }
 0x13e   :  { %v345_v23 = vpop.f32.mrb[30].mxu1 }
 0x13f   :  { %v346_v24 = vpop.f32.mrb[31].mxu1  ;;  %v2829_v23 = vld [vmem:[%s3479_s3 + $0x18] sm:$0xff]  }
 0x14c   :  { %v442_v25 = vpop.f32.mrb[32].mxu1 }
 0x14d   :  { %v444_v26 = vpop.f32.mrb[33].mxu1 }
 0x14e   :  { %v445_v27 = vpop.f32.mrb[34].mxu1  ;;  %v2831_v26 = vld [vmem:[%s3479_s3 + $0x28] sm:$0xff]  }
 0x14f   :  { %v447_v28 = vpop.f32.mrb[35].mxu1 }
 0x150   :  { %v2832_v28 = vld [vmem:[%s3479_s3 + $0x30] sm:$0xff]  }
 0x154   :  { %v450_v29 = vpop.f32.mrb[36].mxu1 }
 0x155   :  { %v452_v30 = vpop.f32.mrb[37].mxu1 }
 0x156   :  { %v453_v31 = vpop.f32.mrb[38].mxu1  ;;  %v2833_v30 = vld [vmem:[%s3479_s3 + $0x38] sm:$0xff]  }
 0x157   :  { %v455_v32 = vpop.f32.mrb[39].mxu1 }
 0x158   :  { %v2834_v32 = vld [vmem:[%s3479_s3 + $0x40] sm:$0xff]  }
 0x15c   :  { %v458_v33 = vpop.f32.mrb[40].mxu1 }
 0x15d   :  { %v460_v34 = vpop.f32.mrb[41].mxu1 }
 0x15e   :  { %v461_v35 = vpop.f32.mrb[42].mxu1 }
 0x15f   :  { %v463_v36 = vpop.f32.mrb[43].mxu1 }
 0x164   :  { %v466_v37 = vpop.f32.mrb[44].mxu1 }
 0x165   :  { %v468_v38 = vpop.f32.mrb[45].mxu1 }
 0x166   :  { %v469_v39 = vpop.f32.mrb[46].mxu1 }
 0x167   :  { %v470_v40 = vpop.f32.mrb[47].mxu1  ;;  %v2837_v39 = vld [vmem:[%s3479_s3 + $0x58] sm:$0xff]  }
 0x174   :  { %v559_v41 = vpop.f32.mrb[48].mxu1 }
 0x175   :  { %v589_v42 = vmax.f32 %v442_v25, %v559_v41  ;;  %v561_v43 = vpop.f32.mrb[49].mxu1  ;;  %v2838_v41 = vld [vmem:[%s3479_s3 + $0x60] sm:$0xff]  }
 0x176   :  { %v562_v45 = vpop.f32.mrb[50].mxu1 }
 0x177   :  { %v596_v46 = vmax.f32 %v348_v3, %v589_v42  ;;  %v590_v47 = vmax.f32 %v445_v27, %v562_v45  ;;  %v564_v48 = vpop.f32.mrb[51].mxu1 }
 0x178   :  { %v2851_v48 = vld [vmem:[%s3481_s5] sm:$0xff]  }
 0x179   :  { %v610_v50 = vadd.f32 %v2301_v44, %v596_v46  ;;  %v597_v51 = vmax.f32 %v349_v6, %v590_v47  ;;  %v2840_v46 = vld [vmem:[%s3479_s3 + $0x70] sm:$0xff]   ;;  %2636 = vmatpush3.bf16.msra.mxu1 %v2851_v48 }
 0x17a   :  { %2637 = vmatprep.subr.bf16.mxu1 %v2890_v49 }
 0x17b   :  { %v617_v52 = vmax.f32 %v610_v50, 0.0  ;;  %v2852_v50 = vld [vmem:[%s3481_s5 + $0x8] sm:$0xff]  }
 0x17c   :  { %v567_v53 = vpop.f32.mrb[52].mxu1 }
 0x17d   :  { %v632_v55 = vpack.c.bf16 %v617_v52, %v617_v52  ;;  %v591_v56 = vmax.f32 %v450_v29, %v567_v53  ;;  %v569_v57 = vpop.f32.mrb[53].mxu1  ;;  %2638 = vmatpush3.bf16.msra.mxu1 %v2852_v50  ;;  %v2853_v53 = vld [vmem:[%s3481_s5 + $0x10] sm:$0xff]  }
 0x17e   :  { %v570_v58 = vpop.f32.mrb[54].mxu1  ;;  %2639 = vmatprep.subr.bf16.mxu1 %v2890_v49 }
 0x17f   :  { %v598_v59 = vmax.f32 %v350_v9, %v591_v56  ;;  %v592_v60 = vmax.f32 %v453_v31, %v570_v58  ;;  %2488 = vmatmul.mubr.msk.bf16.vlgmr.msra.gmra.mrb[0].mxu0 %vm641_vm3, %v632_v55  ;;  %v572_v61 = vpop.f32.mrb[55].mxu1  ;;  %v2828_v9 = vld [vmem:[%s3479_s3 + $0x10] sm:$0xff]   ;;  %v690_v13 = vrot.slane %v632_v55, 1  ;;  %v744_v24 = vrot.slane %v632_v55, 2  ;;  %v2842_v56 = vld [vmem:[%s3479_s3 + $0x80] sm:$0xff]   ;;  %v2856_v58 = vld [vmem:[%s3481_s5 + $0x28] sm:$0xff]  }
 0x180   :  { %2492 = vmatpush3.bf16.msra.mxu0 %v2827_v54  ;;  %2493 = vmatprep.mubr.msk.bf16.mxu0 %vm2891_vm2, %v2890_v49  ;;  %v798_v20 = vrot.slane %v632_v55, 3  ;;  %v2854_v54 = vld [vmem:[%s3481_s5 + $0x18] sm:$0xff]   ;;  %v2855_v55 = vld [vmem:[%s3481_s5 + $0x20] sm:$0xff]   ;;  %v2843_v61 = vld [vmem:[%s3479_s3 + $0x88] sm:$0xff]  }
 0x181   :  { %v3217_v63 = vadd.f32 %v2301_v44, %v598_v59  ;;  %v599_v0 = vmax.f32 %v351_v12, %v592_v60  ;;  %2497 = vmatprep.subr.bf16.mxu0 %v2890_v49  ;;  %2640 = vmatpush3.bf16.msra.mxu1 %v2853_v53  ;;  %v2857_v59 = vld [vmem:[%s3481_s5 + $0x30] sm:$0xff]  }
 0x182   :  { %2641 = vmatprep.subr.bf16.mxu1 %v2890_v49 }
 0x183   :  { %v3220_v1 = vadd.f32 %v2301_v44, %v599_v0  ;;  %v619_v34 = vmax.f32 %v3217_v63, 0.0  ;;  %v2844_v0 = vld [vmem:[%s3479_s3 + $0x90] sm:$0xff]  }
 0x184   :  { %v575_v2 = vpop.f32.mrb[56].mxu1 }
 0x185   :  { %v593_v3 = vmax.f32 %v458_v33, %v575_v2  ;;  %v577_v4 = vpop.f32.mrb[57].mxu1  ;;  %v1066_v36 = vpack.c.bf16 %v619_v34, %v619_v34  ;;  %v620_v43 = vmax.f32 %v3220_v1, 0.0  ;;  %2642 = vmatpush3.bf16.msra.mxu1 %v2854_v54  ;;  %v2845_v2 = vld [vmem:[%s3479_s3 + $0x98] sm:$0xff]  }
 0x186   :  { %v578_v5 = vpop.f32.mrb[58].mxu1  ;;  %2643 = vmatprep.subr.bf16.mxu1 %v2890_v49  ;;  %v2846_v4 = vld [vmem:[%s3479_s3 + $0xa0] sm:$0xff]  }
 0x187   :  { %v600_v6 = vmax.f32 %v352_v15, %v593_v3  ;;  %v594_v7 = vmax.f32 %v461_v35, %v578_v5  ;;  %v580_v8 = vpop.f32.mrb[59].mxu1  ;;  %v2835_v35 = vld [vmem:[%s3479_s3 + $0x48] sm:$0xff]   ;;  %v1124_v38 = vrot.slane %v1066_v36, 1  ;;  %v1178_v40 = vrot.slane %v1066_v36, 2 }
 0x188   :  { %v1232_v42 = vrot.slane %v1066_v36, 3  ;;  %v1283_v45 = vpack.c.bf16 %v620_v43, %v620_v43 }
 0x189   :  { %v3225_v10 = vadd.f32 %v2301_v44, %v600_v6  ;;  %v601_v11 = vmax.f32 %v353_v18, %v594_v7  ;;  %2644 = vmatpush3.bf16.msra.mxu1 %v2855_v55  ;;  %v2847_v7 = vld [vmem:[%s3479_s3 + $0xa8] sm:$0xff]  }
 0x18a   :  { %v1341_v47 = vrot.slane %v1283_v45, 1  ;;  %v1395_v52 = vrot.slane %v1283_v45, 2  ;;  %v1449_v57 = vrot.slane %v1283_v45, 3  ;;  %2645 = vmatprep.subr.bf16.mxu1 %v2890_v49 }
 0x18b   :  { %v3227_v12 = vadd.f32 %v2301_v44, %v601_v11  ;;  %2494 = vmatmul.mubr.msk.bf16.vlgmr.msra.gmra.mrb[0].mxu0 %vm641_vm3, %v690_v13  ;;  %v621_v60 = vmax.f32 %v3225_v10, 0.0  ;;  %v2849_v11 = vld [vmem:[%s3479_s3 + $0xb8] sm:$0xff]  }
 0x18c   :  { %2498 = vmatpush3.bf16.msra.mxu0 %v2828_v9  ;;  %v583_v14 = vpop.f32.mrb[60].mxu1  ;;  %2499 = vmatprep.mubr.msk.bf16.mxu0 %vm2891_vm2, %v2890_v49  ;;  %v2848_v9 = vld [vmem:[%s3479_s3 + $0xb0] sm:$0xff]  }
 0x18d   :  { %v595_v15 = vmax.f32 %v466_v37, %v583_v14  ;;  %2503 = vmatprep.subr.bf16.mxu0 %v2890_v49  ;;  %v585_v16 = vpop.f32.mrb[61].mxu1  ;;  %v2836_v37 = vld [vmem:[%s3479_s3 + $0x50] sm:$0xff]   ;;  %2646 = vmatpush3.bf16.msra.mxu1 %v2856_v58  ;;  %v1500_v63 = vpack.c.bf16 %v621_v60, %v621_v60  ;;  %v622_v6 = vmax.f32 %v3227_v12, 0.0  ;;  %v2850_v12 = vld [vmem:[%s3479_s3 + $0xc0] sm:$0xff]  }
 0x18e   :  { %v586_v17 = vpop.f32.mrb[62].mxu1  ;;  %2647 = vmatprep.subr.bf16.mxu1 %v2890_v49 }
 0x18f   :  { %v602_v19 = vmax.f32 %v354_v21, %v595_v15  ;;  %v587_v18 = vpop.f32.mrb[63].mxu1  ;;  %v611_v21 = vadd.f32 %v2301_v44, %v597_v51  ;;  %v2841_v51 = vld [vmem:[%s3479_s3 + $0x78] sm:$0xff]   ;;  %v1558_v1 = vrot.slane %v1500_v63, 1  ;;  %v1612_v3 = vrot.slane %v1500_v63, 2 }
 0x190   :  { %v1666_v5 = vrot.slane %v1500_v63, 3  ;;  %v1717_v8 = vpack.c.bf16 %v622_v6, %v622_v6  ;;  %v2858_v17 = vld [vmem:[%s3481_s5 + $0x38] ss:$0 sps:$4 sm:$0xff]   ;;  %v2302_v18 = vld [vmem:[%s3480_s4] ss:$0 sm:$0xff] }
 0x191   :  { %v3236_v22 = vadd.f32 %v2301_v44, %v602_v19  ;;  %v618_v25 = vmax.f32 %v611_v21, 0.0  ;;  %v2839_v44 = vld [vmem:[%s3479_s3 + $0x68] sm:$0xff]   ;;  %2648 = vmatpush3.bf16.msra.mxu1 %v2857_v59  ;;  %v2062_v19 = vsel %vm163_vm1, %v2858_v17, 0 }
 0x192   :  { %2649 = vmatprep.subr.bf16.mxu1 %v2890_v49  ;;  %v1775_v10 = vrot.slane %v1717_v8, 1  ;;  %v1829_v13 = vrot.slane %v1717_v8, 2  ;;  %v1883_v14 = vrot.slane %v1717_v8, 3 }
 0x193   :  { %v849_v27 = vpack.c.bf16 %v618_v25, %v618_v25  ;;  %v623_v15 = vmax.f32 %v3236_v22, 0.0  ;;  %v2859_v25 = vld [vmem:[%s3483_s7] sm:$0xff]  }
 0x195   :  { %v907_v29 = vrot.slane %v849_v27, 1  ;;  %v961_v31 = vrot.slane %v849_v27, 2  ;;  %v1015_v33 = vrot.slane %v849_v27, 3  ;;  %v1934_v16 = vpack.c.bf16 %v623_v15, %v623_v15  ;;  %2650 = vmatpush3.bf16.msra.mxu1 %v2062_v19 }
 0x196   :  { %2655 = vmatprep.subr.bf16.mxu1 %v2890_v49 }
 0x197   :  { %2500 = vmatmul.mubr.msk.bf16.vlgmr.msra.gmra.mrb[0].mxu0 %vm641_vm3, %v744_v24 }
 0x198   :  { %2504 = vmatpush3.bf16.msra.mxu0 %v2829_v23  ;;  %2505 = vmatprep.mubr.msk.bf16.mxu0 %vm2891_vm2, %v2890_v49 }
 0x199   :  { %2509 = vmatprep.subr.bf16.mxu0 %v2890_v49 }
 0x1a3   :  { %2506 = vmatmul.mubr.msk.bf16.vlgmr.msra.gmra.mrb[0].mxu0 %vm641_vm3, %v798_v20 }
 0x1a4   :  { %2510 = vmatpush3.bf16.msra.mxu0 %v2830_v62  ;;  %2511 = vmatprep.mubr.msk.bf16.mxu0 %vm2891_vm2, %v2890_v49 }
 0x1a5   :  { %2515 = vmatprep.subr.bf16.mxu0 %v2890_v49 }
 0x1af   :  { %2512 = vmatmul.mubr.msk.bf16.vlgmr.msra.gmra.mrb[0].mxu0 %vm641_vm3, %v849_v27  ;;  %v2860_v27 = vld [vmem:[%s3483_s7 + $0x8] sm:$0xff]  }
 0x1b0   :  { %2516 = vmatpush3.bf16.msra.mxu0 %v2831_v26  ;;  %2517 = vmatprep.mubr.msk.bf16.mxu0 %vm2891_vm2, %v2890_v49 }
 0x1b1   :  { %2521 = vmatprep.subr.bf16.mxu0 %v2890_v49 }
 0x1bb   :  { %2518 = vmatmul.mubr.msk.bf16.vlgmr.msra.gmra.mrb[0].mxu0 %vm641_vm3, %v907_v29  ;;  %v2862_v29 = vld [vmem:[%s3483_s7 + $0x18] sm:$0xff]  }
 0x1bc   :  { %2522 = vmatpush3.bf16.msra.mxu0 %v2832_v28  ;;  %2523 = vmatprep.mubr.msk.bf16.mxu0 %vm2891_vm2, %v2890_v49  ;;  %v2861_v28 = vld [vmem:[%s3483_s7 + $0x10] sm:$0xff]  }
 0x1bd   :  { %2527 = vmatprep.subr.bf16.mxu0 %v2890_v49 }
 0x1c7   :  { %2524 = vmatmul.mubr.msk.bf16.vlgmr.msra.gmra.mrb[0].mxu0 %vm641_vm3, %v961_v31  ;;  %v2864_v31 = vld [vmem:[%s3483_s7 + $0x28] ss:$0 sps:$4 sm:$0x33]  }
 0x1c8   :  { %2528 = vmatpush3.bf16.msra.mxu0 %v2833_v30  ;;  %2529 = vmatprep.mubr.msk.bf16.mxu0 %vm2891_vm2, %v2890_v49  ;;  %v2863_v30 = vld [vmem:[%s3483_s7 + $0x20] sm:$0xff]   ;;  %s2892_s7 = smov [#allocation2]  }
 0x1c9   :  { %2533 = vmatprep.subr.bf16.mxu0 %v2890_v49  ;;  %s2214_s28 = sshll.u32 %s2892_s7, 4  ;;  %s2215_s28 = int_to_ptr.vmem [resolvable:$true] %s2214_s28 }
 0x1ca   :  { %p2870_p1 = scmp.lt.s32.totalorder %s2215_s28, %s2215_s28 }
 0x1d3   :  { %2530 = vmatmul.mubr.msk.bf16.vlgmr.msra.gmra.mrb[0].mxu0 %vm641_vm3, %v1015_v33  ;;  %v2401_v33 = vld [vmem:[%s3482_s6] ss:$0 sm:$0xff]  ;;  %s2865_s6 = scalar_lea.vmem %s2215_s28, 32 }
 0x1d4   :  { %2534 = vmatpush3.bf16.msra.mxu0 %v2834_v32  ;;  %2535 = vmatprep.mubr.msk.bf16.mxu0 %vm2891_vm2, %v2890_v49  ;;  %v2163_v32 = vsel %vm2161_vm5, %v2864_v31, 0  ;;  %p2866_p0 = scmp.ne.s32.totalorder %s2215_s28, %s2865_s6  ;;  %p2871_p2 = scmp.lt.s32.totalorder %s2865_s6, %s2865_s6 }
 0x1d5   :  { %2539 = vmatprep.subr.bf16.mxu0 %v2890_v49 }
 0x1d6   :  { %p2872_p3 = por %p2871_p2, %p2870_p1 }
 0x1d8   :  { %p2873_p4 = pnand %p2872_p3, %p2866_p0 }
 0x1df   :  { %2536 = vmatmul.mubr.msk.bf16.vlgmr.msra.gmra.mrb[0].mxu0 %vm641_vm3, %v1066_v36 }
 0x1e0   :  { %2540 = vmatpush3.bf16.msra.mxu0 %v2835_v35  ;;  %2541 = vmatprep.mubr.msk.bf16.mxu0 %vm2891_vm2, %v2890_v49 }
 0x1e1   :  { %2545 = vmatprep.subr.bf16.mxu0 %v2890_v49 }
 0x1eb   :  { %2542 = vmatmul.mubr.msk.bf16.vlgmr.msra.gmra.mrb[0].mxu0 %vm641_vm3, %v1124_v38 }
 0x1ec   :  { %2546 = vmatpush3.bf16.msra.mxu0 %v2836_v37  ;;  %2547 = vmatprep.mubr.msk.bf16.mxu0 %vm2891_vm2, %v2890_v49 }
 0x1ed   :  { %2551 = vmatprep.subr.bf16.mxu0 %v2890_v49 }
 0x1f7   :  { %2548 = vmatmul.mubr.msk.bf16.vlgmr.msra.gmra.mrb[0].mxu0 %vm641_vm3, %v1178_v40 }
 0x1f8   :  { %2552 = vmatpush3.bf16.msra.mxu0 %v2837_v39  ;;  %2553 = vmatprep.mubr.msk.bf16.mxu0 %vm2891_vm2, %v2890_v49 }
 0x1f9   :  { %2557 = vmatprep.subr.bf16.mxu0 %v2890_v49 }
 0x203   :  { %2554 = vmatmul.mubr.msk.bf16.vlgmr.msra.gmra.mrb[0].mxu0 %vm641_vm3, %v1232_v42 }
 0x204   :  { %2558 = vmatpush3.bf16.msra.mxu0 %v2838_v41  ;;  %2559 = vmatprep.mubr.msk.bf16.mxu0 %vm2891_vm2, %v2890_v49 }
 0x205   :  { %2563 = vmatprep.subr.bf16.mxu0 %v2890_v49 }
 0x20f   :  { %2560 = vmatmul.mubr.msk.bf16.vlgmr.msra.gmra.mrb[0].mxu0 %vm641_vm3, %v1283_v45 }
 0x210   :  { %2564 = vmatpush3.bf16.msra.mxu0 %v2839_v44  ;;  %2565 = vmatprep.mubr.msk.bf16.mxu0 %vm2891_vm2, %v2890_v49 }
 0x211   :  { %2569 = vmatprep.subr.bf16.mxu0 %v2890_v49 }
 0x21b   :  { %2566 = vmatmul.mubr.msk.bf16.vlgmr.msra.gmra.mrb[0].mxu0 %vm641_vm3, %v1341_v47 }
 0x21c   :  { %2570 = vmatpush3.bf16.msra.mxu0 %v2840_v46  ;;  %2571 = vmatprep.mubr.msk.bf16.mxu0 %vm2891_vm2, %v2890_v49 }
 0x21d   :  { %2575 = vmatprep.subr.bf16.mxu0 %v2890_v49 }
 0x227   :  { %2572 = vmatmul.mubr.msk.bf16.vlgmr.msra.gmra.mrb[0].mxu0 %vm641_vm3, %v1395_v52 }
 0x228   :  { %2576 = vmatpush3.bf16.msra.mxu0 %v2841_v51  ;;  %2577 = vmatprep.mubr.msk.bf16.mxu0 %vm2891_vm2, %v2890_v49 }
 0x229   :  { %2581 = vmatprep.subr.bf16.mxu0 %v2890_v49 }
 0x233   :  { %2578 = vmatmul.mubr.msk.bf16.vlgmr.msra.gmra.mrb[0].mxu0 %vm641_vm3, %v1449_v57 }
 0x234   :  { %2582 = vmatpush3.bf16.msra.mxu0 %v2842_v56  ;;  %2583 = vmatprep.mubr.msk.bf16.mxu0 %vm2891_vm2, %v2890_v49 }
 0x235   :  { %2587 = vmatprep.subr.bf16.mxu0 %v2890_v49 }
 0x23f   :  { %2584 = vmatmul.mubr.msk.bf16.vlgmr.msra.gmra.mrb[0].mxu0 %vm641_vm3, %v1500_v63 }
 0x240   :  { %2588 = vmatpush3.bf16.msra.mxu0 %v2843_v61  ;;  %2589 = vmatprep.mubr.msk.bf16.mxu0 %vm2891_vm2, %v2890_v49 }
 0x241   :  { %2593 = vmatprep.subr.bf16.mxu0 %v2890_v49 }
 0x24b   :  { %2590 = vmatmul.mubr.msk.bf16.vlgmr.msra.gmra.mrb[0].mxu0 %vm641_vm3, %v1558_v1 }
 0x24c   :  { %2594 = vmatpush3.bf16.msra.mxu0 %v2844_v0  ;;  %2595 = vmatprep.mubr.msk.bf16.mxu0 %vm2891_vm2, %v2890_v49 }
 0x24d   :  { %2599 = vmatprep.subr.bf16.mxu0 %v2890_v49 }
 0x257   :  { %2596 = vmatmul.mubr.msk.bf16.vlgmr.msra.gmra.mrb[0].mxu0 %vm641_vm3, %v1612_v3 }
 0x258   :  { %2600 = vmatpush3.bf16.msra.mxu0 %v2845_v2  ;;  %2601 = vmatprep.mubr.msk.bf16.mxu0 %vm2891_vm2, %v2890_v49 }
 0x259   :  { %2605 = vmatprep.subr.bf16.mxu0 %v2890_v49 }
 0x263   :  { %2602 = vmatmul.mubr.msk.bf16.vlgmr.msra.gmra.mrb[0].mxu0 %vm641_vm3, %v1666_v5 }
 0x264   :  { %2606 = vmatpush3.bf16.msra.mxu0 %v2846_v4  ;;  %2607 = vmatprep.mubr.msk.bf16.mxu0 %vm2891_vm2, %v2890_v49 }
 0x265   :  { %2611 = vmatprep.subr.bf16.mxu0 %v2890_v49 }
 0x26f   :  { %2608 = vmatmul.mubr.msk.bf16.vlgmr.msra.gmra.mrb[0].mxu0 %vm641_vm3, %v1717_v8 }
 0x270   :  { %2612 = vmatpush3.bf16.msra.mxu0 %v2847_v7  ;;  %2613 = vmatprep.mubr.msk.bf16.mxu0 %vm2891_vm2, %v2890_v49 }
 0x271   :  { %2617 = vmatprep.subr.bf16.mxu0 %v2890_v49 }
 0x27b   :  { %2614 = vmatmul.mubr.msk.bf16.vlgmr.msra.gmra.mrb[0].mxu0 %vm641_vm3, %v1775_v10 }
 0x27c   :  { %2618 = vmatpush3.bf16.msra.mxu0 %v2848_v9  ;;  %2619 = vmatprep.mubr.msk.bf16.mxu0 %vm2891_vm2, %v2890_v49 }
 0x27d   :  { %2623 = vmatprep.subr.bf16.mxu0 %v2890_v49 }
 0x287   :  { %2620 = vmatmul.mubr.msk.bf16.vlgmr.msra.gmra.mrb[0].mxu0 %vm641_vm3, %v1829_v13 }
 0x288   :  { %2624 = vmatpush3.bf16.msra.mxu0 %v2849_v11  ;;  %2625 = vmatprep.mubr.msk.bf16.mxu0 %vm2891_vm2, %v2890_v49 }
 0x289   :  { %2629 = vmatprep.subr.bf16.mxu0 %v2890_v49 }
 0x293   :  { %2626 = vmatmul.mubr.msk.bf16.vlgmr.msra.gmra.mrb[0].mxu0 %vm641_vm3, %v1883_v14 }
 0x294   :  { %2630 = vmatpush3.bf16.msra.mxu0 %v2850_v12  ;;  %2631 = vmatprep.mubr.msk.bf16.mxu0 %vm2891_vm2, %v2890_v49 }
 0x29f   :  { %2632 = vmatmul.mubr.msk.bf16.vlgmr.msra.gmra.mrb[0].mxu0 %vm641_vm3, %v1934_v16 }
 0x372   :  { %v1981_v23 = vpop.f32.mrb[0].mxu0 }
 0x373   :  { %v2671_v24 = vadd.f32 %v2302_v18, %v1981_v23  ;;  %v2633_v62 = vpop.f32.mrb[1].mxu0 }
 0x374   :  { %v1984_v22 = vpop.f32.mrb[2].mxu0 }
 0x375   :  { %v1988_v20 = vmax.f32 %v2671_v24, 0.0  ;;  %v2634_v21 = vpop.f32.mrb[3].mxu0 }
 0x377   :  { %v1989_v26 = vpack.c.bf16 %v1988_v20, %v1988_v20 }
 0x379   :  { %2652 = vmatmul.mubr.msk.bf16.vlgmr.msra.gmra.mrb[64].mxu1 %vm2057_vm4, %v1989_v26 }
 0x37a   :  { %2656 = vmatpush3.bf16.msra.mxu1 %v2859_v25  ;;  %2667 = vmatprep.mubr.msk.bf16.mxu1 %vm2891_vm2, %v2890_v49 }
 0x37b   :  { %2657 = vmatprep.subr.bf16.mxu1 %v2890_v49 }
 0x37e   :  { %2658 = vmatpush3.bf16.msra.mxu1 %v2860_v27 }
 0x37f   :  { %2659 = vmatprep.subr.bf16.mxu1 %v2890_v49 }
 0x382   :  { %2660 = vmatpush3.bf16.msra.mxu1 %v2861_v28 }
 0x383   :  { %2661 = vmatprep.subr.bf16.mxu1 %v2890_v49 }
 0x386   :  { %2662 = vmatpush3.bf16.msra.mxu1 %v2862_v29 }
 0x387   :  { %2663 = vmatprep.subr.bf16.mxu1 %v2890_v49 }
 0x38a   :  { %2664 = vmatpush3.bf16.msra.mxu1 %v2863_v30 }
 0x38b   :  { %2665 = vmatprep.subr.bf16.mxu1 %v2890_v49  ;;  %v2411_v49 = vld [vmem:[%s3484_s8] ss:$0 sm:$0xff] }
 0x38e   :  { %2666 = vmatpush3.bf16.msra.mxu1 %v2163_v32 }
 0x44c   :  { %v2098_v34 = vpop.f32.mrb[64].mxu1 }
 0x44d   :  { %v2099_v35 = vadd.f32 %v2401_v33, %v2098_v34  ;;  %v2653_v36 = vpop.f32.mrb[65].mxu1 }
 0x44e   :  { %v2101_v37 = vpop.f32.mrb[66].mxu1 }
 0x44f   :  { %v2104_v38 = vmax.f32 %v2099_v35, 0.0  ;;  %v2654_v39 = vpop.f32.mrb[67].mxu1 }
 0x451   :  { %v2105_v40 = vpack.c.bf16 %v2104_v38, %v2104_v38 }
 0x453   :  { %2668 = vmatmul.mubr.msk.bf16.vlgmr.msra.gmra.mrb[68].mxu1 %vm2157_vm6, %v2105_v40 }
 0x526   :  { %v2199_v41 = vpop.f32.mrb[68].mxu1 }
 0x527   :  { %v2200_v42 = vadd.f32 %v2411_v49, %v2199_v41  ;;  %v2669_v43 = vpop.f32.mrb[69].mxu1 }
 0x528   :  { %v2202_v44 = vpop.f32.mrb[70].mxu1 }
 0x529   :  { %v2205_v45 = vmax.f32 %v2200_v42, 0.0  ;;  %v2670_v46 = vpop.f32.mrb[71].mxu1 }
 0x52b   :  { %2207 = vst.msk [vmem:[#allocation2] sm:$0x3] %vm2206_vm7, %v2205_v45 }
 0x52c   :  { %2876 = shalt.err (!%p2873_p4)
}
 0x52d   :  { %s2877_s30 = scalar_lea.hbm %s3485_s9, 32 }
 0x52e   :  { %p2878_p5 = scmp.ne.s32.totalorder %s3485_s9, %s2877_s30  ;;  %p2881_p6 = scmp.lt.u32.totalorder %s2877_s30, %s3485_s9 }
 0x530   :  { %p2883_p7 = pnand %p2881_p6, %p2878_p5 }
 0x532   :  { %2886 = shalt.err (!%p2883_p7)
}
 0x533   :  { %2217 = dma.vmem_to_hbm [thread:$0]  %s2215_s28, 32, %s3485_s9, [#allocation3]  }
 0x534   :  { %2887 = dma.done.wait [#allocation3], 32  }
 0x535   :  { %2888 = vsyncadd [#allocation3], 4294967264 }
 0x536   :  { %2221 = vsyncpa [#allocation3], 1 }

</bundles_post_ra>
